<compile_context>
chip_gen: v7x
topology: tpu7x:2x2x1
jax: 0.10.0
libtpu: 0.0.40
codegen_flags: <defaults>
</compile_context>

<pallas_src>
import numpy as np
import jax
import jax.numpy as jnp
from jax import lax
from jax.experimental import pallas as pl
from jax.experimental.pallas import tpu as pltpu


def _bilstm_crf_kernel(emb_ref,            # (L, 2E)  [emb(t) | emb(L-1-t)]
                       wih_ref,            # (2E, 8*H2) fused input weights (zero blocks for cross terms)
                       b_ref,              # (1, 8*H2) fused gate bias (b_ih + b_hh, both directions)
                       whh_ref,            # (2*H2, 8*H2) block-diagonal recurrent weights
                       h0_ref, c0_ref,     # (1, 2*H2) initial states  [fwd | bwd]
                       wp_ref, bp_ref,     # (2*H2, LBL), (1, LBL)  tag projection (row orientation)
                       wpt_ref, bpt_ref,   # (LBL, 2*H2), (LBL, 1)  tag projection (column orientation)
                       trans_ref,          # (T, T)   CRF transitions (extra "begin" tag = last row)
                       transt_ref,         # (T, T)   transitions transposed (packed once)
                       score_ref,          # out (1, 1) f32 best path score
                       pred_ref,           # out (1, L) int32 decoded tag sequence
                       xg_scr,             # scratch (L, 8*H2) precomputed input-gate contributions
                       hid_scr):           # scratch (L, 2*H2) hidden history [fwd | bwd]
    L = emb_ref.shape[0]
    H2 = h0_ref.shape[1] // 2
    G = whh_ref.shape[1]                   # 8 * H2
    T = trans_ref.shape[0]
    LBL = T - 1

    # ---- batched input projection: ONE MXU matmul for all steps / gates / directions ----
    xg_scr[...] = (jnp.dot(emb_ref[...], wih_ref[...],
                           preferred_element_type=jnp.float32) + b_ref[...])

    # ---- recurrence: per step one (1,2H2)@(2H2,8H2) matmul + fused nonlinearity slabs ----
    w_hh = whh_ref[...]
    h = h0_ref[...]                        # (1, 2*H2)  [fwd | bwd]
    c = c0_ref[...]
    # L is a small compile-time constant -> static unroll.
    # TODO(synk): switch to lax.fori_loop(..., unroll=2-4) for realistic sentence lengths.
    for i in range(L):
        gates = xg_scr[pl.ds(i, 1), :] + jnp.dot(h, w_hh,
                                                 preferred_element_type=jnp.float32)
        sg = jax.nn.sigmoid(gates[:, 0:6 * H2])       # [i_f i_b | f_f f_b | o_f o_b]
        gg = jnp.tanh(gates[:, 6 * H2:G])             # [g_f g_b]
        c = sg[:, 2 * H2:4 * H2] * c + sg[:, 0:2 * H2] * gg
        h = sg[:, 4 * H2:6 * H2] * jnp.tanh(c)
        hid_scr[pl.ds(i, 1), 0:H2] = h[:, 0:H2]               # fwd hidden at time i
        hid_scr[pl.ds(L - 1 - i, 1), H2:2 * H2] = h[:, H2:2 * H2]  # bwd hidden at time L-1-i

    # ---- emission features (kept in registers, both orientations via MXU) ---------------
    hid = hid_scr[...]
    feats = jnp.dot(hid, wp_ref[...],
                    preferred_element_type=jnp.float32) + bp_ref[...]          # (L, LBL)
    feats_t = lax.dot_general(wpt_ref[...], hid,
                              dimension_numbers=(((1,), (1,)), ((), ())),
                              preferred_element_type=jnp.float32) + bpt_ref[...]  # (LBL, L)

    # ---- Viterbi max-plus DP, alternating row/column orientation -------------------------
    trans = trans_ref[...]
    trans_sub = trans[0:LBL, 0:LBL]
    transt_sub = transt_ref[...][0:LBL, 0:LBL]
    row_i = lax.broadcasted_iota(jnp.int32, (LBL, LBL), 0)
    col_i = lax.broadcasted_iota(jnp.int32, (LBL, LBL), 1)
    lane_lbl = lax.broadcasted_iota(jnp.int32, (1, LBL), 1)
    sub_lbl = lax.broadcasted_iota(jnp.int32, (LBL, 1), 0)

    # t == 0: start from the extra "begin" tag (last transition row).  Row orientation.
    prev = trans[LBL:LBL + 1, 0:LBL] + feats[0:1, :]
    ptrs = [None] * L                       # backpointers stay in registers
    for t in range(1, L):
        if t % 2 == 1:
            # prev is a ROW over previous tags -> use trans^T, reduce over lanes.
            s = transt_sub + prev                                   # s[j, i]
            best = jnp.max(s, axis=1, keepdims=True)                # (LBL, 1)
            ptrs[t] = jnp.min(jnp.where(s == best, col_i, LBL),
                              axis=1, keepdims=True)                # first argmax
            prev = best + feats_t[:, t:t + 1]                       # -> column orientation
        else:
            # prev is a COLUMN over previous tags -> use trans, reduce over sublanes.
            s = trans_sub + prev                                    # s[i, j]
            best = jnp.max(s, axis=0, keepdims=True)                # (1, LBL)
            ptrs[t] = jnp.min(jnp.where(s == best, row_i, LBL),
                              axis=0, keepdims=True)                # first argmax
            prev = best + feats[t:t + 1, :]                         # -> row orientation

    if (L - 1) % 2 == 1:                                            # final prev is a column
        last_score = jnp.max(prev, axis=0, keepdims=True)
        last_ptr = jnp.min(jnp.where(prev == last_score, sub_lbl, LBL),
                           axis=0, keepdims=True)
    else:                                                           # final prev is a row
        last_score = jnp.max(prev, axis=1, keepdims=True)
        last_ptr = jnp.min(jnp.where(prev == last_score, lane_lbl, LBL),
                           axis=1, keepdims=True)
    score_ref[...] = last_score

    # ---- backtrack: build pred in-register, single lane-dense store ----------------------
    lane_L = lax.broadcasted_iota(jnp.int32, (1, L), 1)
    pred = jnp.where(lane_L == (L - 1), last_ptr, 0)
    for t in range(L - 1, 0, -1):
        if t % 2 == 1:   # column-oriented backpointers (current tag in sublanes)
            last_ptr = jnp.sum(jnp.where(sub_lbl == last_ptr, ptrs[t], 0),
                               axis=0, keepdims=True)
        else:            # row-oriented backpointers (current tag in lanes)
            last_ptr = jnp.sum(jnp.where(lane_lbl == last_ptr, ptrs[t], 0),
                               axis=1, keepdims=True)
        pred = jnp.where(lane_L == (t - 1), last_ptr, pred)
    pred_ref[...] = pred


def pack_params(params):
    """One-time parameter re-layout (model-load time, NOT in the per-call path)."""
    H2 = params["w_hh_f"].shape[1]
    E = params["w_ih_f"].shape[1]
    T = params["w_proj"].shape[0]
    LBL = T - 1

    def gsplit(w):  # torch gate packing along dim 0: (i, f, g, o)
        return w[0:H2], w[H2:2 * H2], w[2 * H2:3 * H2], w[3 * H2:4 * H2]

    # ---- fused input weights: [emb | emb_rev] @ W -> all gates, both directions ----
    i_f, f_f, g_f, o_f = gsplit(params["w_ih_f"])
    i_b, f_b, g_b, o_b = gsplit(params["w_ih_b"])
    zE = jnp.zeros((E, H2), jnp.float32)
    row_fwd = jnp.concatenate([i_f.T, zE, f_f.T, zE, o_f.T, zE, g_f.T, zE], axis=1)
    row_bwd = jnp.concatenate([zE, i_b.T, zE, f_b.T, zE, o_b.T, zE, g_b.T], axis=1)
    w_ih_comb = jnp.concatenate([row_fwd, row_bwd], axis=0)          # (2E, 8*H2)

    # ---- block-diagonal recurrent weights ----
    hi_f, hf_f, hg_f, ho_f = gsplit(params["w_hh_f"])
    hi_b, hf_b, hg_b, ho_b = gsplit(params["w_hh_b"])
    zH = jnp.zeros((H2, H2), jnp.float32)

    def bd(wf, wb):
        return jnp.concatenate([jnp.concatenate([wf.T, zH], axis=1),
                                jnp.concatenate([zH, wb.T], axis=1)], axis=0)

    w_hh_bd = jnp.concatenate([bd(hi_f, hi_b), bd(hf_f, hf_b),
                               bd(ho_f, ho_b), bd(hg_f, hg_b)], axis=1)  # (2*H2, 8*H2)

    # ---- fused bias, gate order (i, f, o, g), direction-interleaved ----
    def bsplit(b):
        return b[0:H2], b[H2:2 * H2], b[2 * H2:3 * H2], b[3 * H2:4 * H2]

    bi_f, bf_f, bg_f, bo_f = bsplit(params["b_ih_f"] + params["b_hh_f"])
    bi_b, bf_b, bg_b, bo_b = bsplit(params["b_ih_b"] + params["b_hh_b"])
    b_all = jnp.concatenate([bi_f, bi_b, bf_f, bf_b,
                             bo_f, bo_b, bg_f, bg_b]).reshape(1, 8 * H2)

    w_proj = params["w_proj"]
    b_proj = params["b_proj"]
    return dict(
        embedding=params["embedding"].astype(jnp.float32),
        w_ih_comb=w_ih_comb.astype(jnp.float32),
        b_all=b_all.astype(jnp.float32),
        w_hh_bd=w_hh_bd.astype(jnp.float32),
        h0=jnp.concatenate([params["h0"][0, 0], params["h0"][1, 0]]).reshape(1, 2 * H2).astype(jnp.float32),
        c0=jnp.concatenate([params["c0"][0, 0], params["c0"][1, 0]]).reshape(1, 2 * H2).astype(jnp.float32),
        wp_lbl=w_proj[0:LBL, :].T.astype(jnp.float32),               # (2*H2, LBL)
        bp_lbl=b_proj[0:LBL].reshape(1, LBL).astype(jnp.float32),
        wpt_lbl=w_proj[0:LBL, :].astype(jnp.float32),                # (LBL, 2*H2)
        bpt_lbl=b_proj[0:LBL].reshape(LBL, 1).astype(jnp.float32),
        transition=params["transition"].astype(jnp.float32),
        transition_t=params["transition"].T.astype(jnp.float32),
    )


@jax.jit
def bilstm_crf_forward(sentence, packed):
    L = sentence.shape[1]
    H2 = packed["h0"].shape[1] // 2
    ids = sentence[0].astype(jnp.int32)                              # (L,)
    # Gather only the needed L rows (the full (V, E) table never enters VMEM).
    emb_rows = jnp.take(packed["embedding"], ids, axis=0)            # (L, E)
    emb_comb = jnp.concatenate([emb_rows, emb_rows[::-1]], axis=1)   # (L, 2E)

    vmem = pl.BlockSpec(memory_space=pltpu.MemorySpace.VMEM)
    # Gridless single invocation: total resident data is a few KB, so a grid would only
    # add per-step overhead (latency-bound kernel).
    # TODO(synk): for batched serving on v7x add a leading "parallel" sentence grid axis
    #             so both TensorCores run independent sequences.
    score, pred = pl.pallas_call(
        _bilstm_crf_kernel,
        out_shape=(jax.ShapeDtypeStruct((1, 1), jnp.float32),
                   jax.ShapeDtypeStruct((1, L), jnp.int32)),
        in_specs=[vmem] * 12,
        out_specs=(vmem, vmem),
        scratch_shapes=[pltpu.VMEM((L, 8 * H2), jnp.float32),
                        pltpu.VMEM((L, 2 * H2), jnp.float32)],
    )(emb_comb, packed["w_ih_comb"], packed["b_all"], packed["w_hh_bd"],
      packed["h0"], packed["c0"], packed["wp_lbl"], packed["bp_lbl"],
      packed["wpt_lbl"], packed["bpt_lbl"],
      packed["transition"], packed["transition_t"])

    # matches torch: (last_score.unsqueeze(0) -> (1,), pred_label.unsqueeze(0) -> (1, L))
    return score.reshape(1), pred


def make_params(key, vocab_size, tag_vocab_size, embedding_dim, hidden_dim):
    T = tag_vocab_size + 1
    H2 = hidden_dim // 2
    ks = jax.random.split(key, 14)

    def n(k, shape, scale=0.1):
        return (scale * jax.random.normal(k, shape)).astype(jnp.float32)

    return dict(
        embedding=n(ks[0], (vocab_size, embedding_dim), 1.0),
        w_ih_f=n(ks[1], (4 * H2, embedding_dim)),
        w_hh_f=n(ks[2], (4 * H2, H2)),
        b_ih_f=n(ks[3], (4 * H2,)),
        b_hh_f=n(ks[4], (4 * H2,)),
        w_ih_b=n(ks[5], (4 * H2, embedding_dim)),
        w_hh_b=n(ks[6], (4 * H2, H2)),
        b_ih_b=n(ks[7], (4 * H2,)),
        b_hh_b=n(ks[8], (4 * H2,)),
        w_proj=n(ks[9], (T, hidden_dim)),
        b_proj=n(ks[10], (T,)),
        # module inits transition as zeros; use deterministic random values so the
        # Viterbi decode is non-trivial (same shapes / semantics).
        transition=n(ks[11], (T, T), 0.5),
        h0=n(ks[12], (2, 1, H2), 1.0),    # init_hidden(): randn(2, 1, hidden//2)
        c0=n(ks[13], (2, 1, H2), 1.0),
    )


def reference_forward(sentence, params):
    """Pure numpy mirror of the PyTorch module's forward (eval mode)."""
    ids = np.asarray(sentence[0])
    emb = np.asarray(params["embedding"])[ids]
    H2 = params["w_hh_f"].shape[1]
    L = emb.shape[0]
    sig = lambda v: 1.0 / (1.0 + np.exp(-v))

    def lstm_dir(w_ih, w_hh, b_ih, b_hh, h0, c0, reverse):
        w_ih, w_hh = np.asarray(w_ih), np.asarray(w_hh)
        b = np.asarray(b_ih) + np.asarray(b_hh)
        h, c = np.asarray(h0)[0], np.asarray(c0)[0]
        outs = np.zeros((L, H2), np.float32)
        order = range(L - 1, -1, -1) if reverse else range(L)
        for t in order:
            z = emb[t] @ w_ih.T + h @ w_hh.T + b
            i_g, f_g = sig(z[:H2]), sig(z[H2:2 * H2])
            g_g, o_g = np.tanh(z[2 * H2:3 * H2]), sig(z[3 * H2:])
            c = f_g * c + i_g * g_g
            h = o_g * np.tanh(c)
            outs[t] = h
        return outs

    hf = lstm_dir(params["w_ih_f"], params["w_hh_f"], params["b_ih_f"],
                  params["b_hh_f"], params["h0"][0], params["c0"][0], False)
    hb = lstm_dir(params["w_ih_b"], params["w_hh_b"], params["b_ih_b"],
                  params["b_hh_b"], params["h0"][1], params["c0"][1], True)
    out = np.concatenate([hf, hb], axis=1)
    feats = out @ np.asarray(params["w_proj"]).T + np.asarray(params["b_proj"])
    trans = np.asarray(params["transition"])
    LBL = trans.shape[0] - 1

    score = np.zeros((L, LBL), np.float32)
    ptr = np.zeros((L, LBL), np.int64)
    score[0] = trans[-1, :-1] + feats[0, :-1]
    for t in range(1, L):
        m = trans[:-1, :-1] + feats[t, :-1][None, :] + score[t - 1][:, None]
        ptr[t] = np.argmax(m, axis=0)
        score[t] = np.max(m, axis=0)
    last_ptr = int(np.argmax(score[-1]))
    last_score = float(np.max(score[-1]))
    pred = np.zeros((L,), np.int64)
    pred[-1] = last_ptr
    for t in range(L - 1, 0, -1):
        last_ptr = int(ptr[t, last_ptr])
        pred[t - 1] = last_ptr
    return last_score, pred


if __name__ == "__main__":
    vocab_size, tag_vocab_size = 50, 6       # tagset_size T = 7
    embedding_dim, hidden_dim = 16, 32       # H2 = 16 per direction
    seq_len = 8

    key = jax.random.PRNGKey(0)
    pkey, skey = jax.random.split(key)
    params = make_params(pkey, vocab_size, tag_vocab_size, embedding_dim, hidden_dim)
    sentence = jax.random.randint(skey, (1, seq_len), 0, vocab_size, dtype=jnp.int32)

    packed = pack_params(params)             # one-time re-layout, outside the call path

    last_score, pred_label = bilstm_crf_forward(sentence, packed)
    jax.block_until_ready((last_score, pred_label))

    ref_score, ref_pred = reference_forward(np.asarray(sentence), params)
    assert np.allclose(np.asarray(last_score)[0], ref_score, atol=1e-3, rtol=1e-3), (
        float(np.asarray(last_score)[0]), ref_score)
    assert np.array_equal(np.asarray(pred_label)[0], ref_pred), (
        np.asarray(pred_label), ref_pred)

    print("KERNEL_OK")
</pallas_src>

<mosaic_0001>
module attributes {stable_mosaic.version = 11 : i64} {
  func.func @_bilstm_crf_kernel(%arg0: memref<8x32xf32, #tpu.memory_space<vmem>>, %arg1: memref<32x128xf32, #tpu.memory_space<vmem>>, %arg2: memref<1x128xf32, #tpu.memory_space<vmem>>, %arg3: memref<32x128xf32, #tpu.memory_space<vmem>>, %arg4: memref<1x32xf32, #tpu.memory_space<vmem>>, %arg5: memref<1x32xf32, #tpu.memory_space<vmem>>, %arg6: memref<32x6xf32, #tpu.memory_space<vmem>>, %arg7: memref<1x6xf32, #tpu.memory_space<vmem>>, %arg8: memref<6x32xf32, #tpu.memory_space<vmem>>, %arg9: memref<6x1xf32, #tpu.memory_space<vmem>>, %arg10: memref<7x7xf32, #tpu.memory_space<vmem>>, %arg11: memref<7x7xf32, #tpu.memory_space<vmem>>, %arg12: memref<1x1xf32, #tpu.memory_space<vmem>>, %arg13: memref<1x8xi32, #tpu.memory_space<vmem>>, %arg14: memref<8x128xf32, #tpu.memory_space<vmem>>, %arg15: memref<8x32xf32, #tpu.memory_space<vmem>>) attributes {dimension_semantics = [], scalar_prefetch = 0 : i64, scratch_operands = 2 : i64, tpu.core_type = #tpu.core_type<tc>} {
    %c0 = arith.constant 0 : index
    %c0_0 = arith.constant 0 : index
    %0 = vector.load %arg0[%c0, %c0_0] : memref<8x32xf32, #tpu.memory_space<vmem>>, vector<8x32xf32>
    %c0_1 = arith.constant 0 : index
    %c0_2 = arith.constant 0 : index
    %1 = vector.load %arg1[%c0_1, %c0_2] : memref<32x128xf32, #tpu.memory_space<vmem>>, vector<32x128xf32>
    %cst = arith.constant dense<0.000000e+00> : vector<8x128xf32>
    %2 = tpu.matmul %0, %1, %cst {dimension_numbers = #tpu.dot_dimension_numbers<[1], [0], [0], [1], [0, 0, 1, 1], [], []>} : vector<8x32xf32>, vector<32x128xf32>, vector<8x128xf32> -> vector<8x128xf32>
    %c0_3 = arith.constant 0 : index
    %c0_4 = arith.constant 0 : index
    %3 = vector.load %arg2[%c0_3, %c0_4] : memref<1x128xf32, #tpu.memory_space<vmem>>, vector<1x128xf32>
    %4 = vector.broadcast %3 : vector<1x128xf32> to vector<8x128xf32>
    %5 = arith.addf %2, %4 : vector<8x128xf32>
    %c0_5 = arith.constant 0 : index
    %c0_6 = arith.constant 0 : index
    %6 = vector.load %arg14[%c0_5, %c0_6] : memref<8x128xf32, #tpu.memory_space<vmem>>, vector<8x128xf32>
    tpu.vector_store %arg14[%c0_5, %c0_6], %5 {strides = array<i32>} : memref<8x128xf32, #tpu.memory_space<vmem>>, vector<8x128xf32>,
    %c0_7 = arith.constant 0 : index
    %c0_8 = arith.constant 0 : index
    %7 = vector.load %arg3[%c0_7, %c0_8] : memref<32x128xf32, #tpu.memory_space<vmem>>, vector<32x128xf32>
    %c0_9 = arith.constant 0 : index
    %c0_10 = arith.constant 0 : index
    %8 = vector.load %arg4[%c0_9, %c0_10] : memref<1x32xf32, #tpu.memory_space<vmem>>, vector<1x32xf32>
    %c0_11 = arith.constant 0 : index
    %c0_12 = arith.constant 0 : index
    %9 = vector.load %arg5[%c0_11, %c0_12] : memref<1x32xf32, #tpu.memory_space<vmem>>, vector<1x32xf32>
    %c0_13 = arith.constant 0 : index
    %c0_14 = arith.constant 0 : index
    %10 = vector.load %arg14[%c0_13, %c0_14] : memref<8x128xf32, #tpu.memory_space<vmem>>, vector<1x128xf32>
    %cst_15 = arith.constant dense<0.000000e+00> : vector<1x128xf32>
    %11 = tpu.matmul %8, %7, %cst_15 {dimension_numbers = #tpu.dot_dimension_numbers<[1], [0], [0], [1], [0, 0, 1, 1], [], []>} : vector<1x32xf32>, vector<32x128xf32>, vector<1x128xf32> -> vector<1x128xf32>
    %12 = arith.addf %10, %11 : vector<1x128xf32>
    %13 = vector.extract_strided_slice %12 {offsets = [0, 0], sizes = [1, 96], strides = [1, 1]} : vector<1x128xf32> to vector<1x96xf32>
    %14 = arith.negf %13 : vector<1x96xf32>
    %15 = math.exp %14 : vector<1x96xf32>
    %cst_16 = arith.constant 1.000000e+00 : f32
    %16 = vector.broadcast %cst_16 : f32 to vector<1x96xf32>
    %17 = arith.addf %16, %15 : vector<1x96xf32>
    %18 = arith.divf %16, %17 : vector<1x96xf32>
    %19 = vector.extract_strided_slice %12 {offsets = [0, 96], sizes = [1, 32], strides = [1, 1]} : vector<1x128xf32> to vector<1x32xf32>
    %20 = math.tanh %19 : vector<1x32xf32>
    %21 = vector.extract_strided_slice %18 {offsets = [0, 32], sizes = [1, 32], strides = [1, 1]} : vector<1x96xf32> to vector<1x32xf32>
    %22 = arith.mulf %21, %9 : vector<1x32xf32>
    %23 = vector.extract_strided_slice %18 {offsets = [0, 0], sizes = [1, 32], strides = [1, 1]} : vector<1x96xf32> to vector<1x32xf32>
    %24 = arith.mulf %23, %20 : vector<1x32xf32>
    %25 = arith.addf %22, %24 : vector<1x32xf32>
    %26 = vector.extract_strided_slice %18 {offsets = [0, 64], sizes = [1, 32], strides = [1, 1]} : vector<1x96xf32> to vector<1x32xf32>
    %27 = math.tanh %25 : vector<1x32xf32>
    %28 = arith.mulf %26, %27 : vector<1x32xf32>
    %29 = vector.extract_strided_slice %28 {offsets = [0, 0], sizes = [1, 16], strides = [1, 1]} : vector<1x32xf32> to vector<1x16xf32>
    %c0_17 = arith.constant 0 : index
    %c0_18 = arith.constant 0 : index
    %30 = vector.load %arg15[%c0_17, %c0_18] : memref<8x32xf32, #tpu.memory_space<vmem>>, vector<1x16xf32>
    tpu.vector_store %arg15[%c0_17, %c0_18], %29 {strides = array<i32>} : memref<8x32xf32, #tpu.memory_space<vmem>>, vector<1x16xf32>,
    %31 = vector.extract_strided_slice %28 {offsets = [0, 16], sizes = [1, 16], strides = [1, 1]} : vector<1x32xf32> to vector<1x16xf32>
    %c7 = arith.constant 7 : index
    %c16 = arith.constant 16 : index
    %32 = vector.load %arg15[%c7, %c16] : memref<8x32xf32, #tpu.memory_space<vmem>>, vector<1x16xf32>
    tpu.vector_store %arg15[%c7, %c16], %31 {strides = array<i32>} : memref<8x32xf32, #tpu.memory_space<vmem>>, vector<1x16xf32>,
    %c1 = arith.constant 1 : index
    %c0_19 = arith.constant 0 : index
    %33 = vector.load %arg14[%c1, %c0_19] : memref<8x128xf32, #tpu.memory_space<vmem>>, vector<1x128xf32>
    %cst_20 = arith.constant dense<0.000000e+00> : vector<1x128xf32>
    %34 = tpu.matmul %28, %7, %cst_20 {dimension_numbers = #tpu.dot_dimension_numbers<[1], [0], [0], [1], [0, 0, 1, 1], [], []>} : vector<1x32xf32>, vector<32x128xf32>, vector<1x128xf32> -> vector<1x128xf32>
    %35 = arith.addf %33, %34 : vector<1x128xf32>
    %36 = vector.extract_strided_slice %35 {offsets = [0, 0], sizes = [1, 96], strides = [1, 1]} : vector<1x128xf32> to vector<1x96xf32>
    %37 = arith.negf %36 : vector<1x96xf32>
    %38 = math.exp %37 : vector<1x96xf32>
    %cst_21 = arith.constant 1.000000e+00 : f32
    %39 = vector.broadcast %cst_21 : f32 to vector<1x96xf32>
    %40 = arith.addf %39, %38 : vector<1x96xf32>
    %41 = arith.divf %39, %40 : vector<1x96xf32>
    %42 = vector.extract_strided_slice %35 {offsets = [0, 96], sizes = [1, 32], strides = [1, 1]} : vector<1x128xf32> to vector<1x32xf32>
    %43 = math.tanh %42 : vector<1x32xf32>
    %44 = vector.extract_strided_slice %41 {offsets = [0, 32], sizes = [1, 32], strides = [1, 1]} : vector<1x96xf32> to vector<1x32xf32>
    %45 = arith.mulf %44, %25 : vector<1x32xf32>
    %46 = vector.extract_strided_slice %41 {offsets = [0, 0], sizes = [1, 32], strides = [1, 1]} : vector<1x96xf32> to vector<1x32xf32>
    %47 = arith.mulf %46, %43 : vector<1x32xf32>
    %48 = arith.addf %45, %47 : vector<1x32xf32>
    %49 = vector.extract_strided_slice %41 {offsets = [0, 64], sizes = [1, 32], strides = [1, 1]} : vector<1x96xf32> to vector<1x32xf32>
    %50 = math.tanh %48 : vector<1x32xf32>
    %51 = arith.mulf %49, %50 : vector<1x32xf32>
    %52 = vector.extract_strided_slice %51 {offsets = [0, 0], sizes = [1, 16], strides = [1, 1]} : vector<1x32xf32> to vector<1x16xf32>
    %c1_22 = arith.constant 1 : index
    %c0_23 = arith.constant 0 : index
    %53 = vector.load %arg15[%c1_22, %c0_23] : memref<8x32xf32, #tpu.memory_space<vmem>>, vector<1x16xf32>
    tpu.vector_store %arg15[%c1_22, %c0_23], %52 {strides = array<i32>} : memref<8x32xf32, #tpu.memory_space<vmem>>, vector<1x16xf32>,
    %54 = vector.extract_strided_slice %51 {offsets = [0, 16], sizes = [1, 16], strides = [1, 1]} : vector<1x32xf32> to vector<1x16xf32>
    %c6 = arith.constant 6 : index
    %c16_24 = arith.constant 16 : index
    %55 = vector.load %arg15[%c6, %c16_24] : memref<8x32xf32, #tpu.memory_space<vmem>>, vector<1x16xf32>
    tpu.vector_store %arg15[%c6, %c16_24], %54 {strides = array<i32>} : memref<8x32xf32, #tpu.memory_space<vmem>>, vector<1x16xf32>,
    %c2 = arith.constant 2 : index
    %c0_25 = arith.constant 0 : index
    %56 = vector.load %arg14[%c2, %c0_25] : memref<8x128xf32, #tpu.memory_space<vmem>>, vector<1x128xf32>
    %cst_26 = arith.constant dense<0.000000e+00> : vector<1x128xf32>
    %57 = tpu.matmul %51, %7, %cst_26 {dimension_numbers = #tpu.dot_dimension_numbers<[1], [0], [0], [1], [0, 0, 1, 1], [], []>} : vector<1x32xf32>, vector<32x128xf32>, vector<1x128xf32> -> vector<1x128xf32>
    %58 = arith.addf %56, %57 : vector<1x128xf32>
    %59 = vector.extract_strided_slice %58 {offsets = [0, 0], sizes = [1, 96], strides = [1, 1]} : vector<1x128xf32> to vector<1x96xf32>
    %60 = arith.negf %59 : vector<1x96xf32>
    %61 = math.exp %60 : vector<1x96xf32>
    %cst_27 = arith.constant 1.000000e+00 : f32
    %62 = vector.broadcast %cst_27 : f32 to vector<1x96xf32>
    %63 = arith.addf %62, %61 : vector<1x96xf32>
    %64 = arith.divf %62, %63 : vector<1x96xf32>
    %65 = vector.extract_strided_slice %58 {offsets = [0, 96], sizes = [1, 32], strides = [1, 1]} : vector<1x128xf32> to vector<1x32xf32>
    %66 = math.tanh %65 : vector<1x32xf32>
    %67 = vector.extract_strided_slice %64 {offsets = [0, 32], sizes = [1, 32], strides = [1, 1]} : vector<1x96xf32> to vector<1x32xf32>
    %68 = arith.mulf %67, %48 : vector<1x32xf32>
    %69 = vector.extract_strided_slice %64 {offsets = [0, 0], sizes = [1, 32], strides = [1, 1]} : vector<1x96xf32> to vector<1x32xf32>
    %70 = arith.mulf %69, %66 : vector<1x32xf32>
    %71 = arith.addf %68, %70 : vector<1x32xf32>
    %72 = vector.extract_strided_slice %64 {offsets = [0, 64], sizes = [1, 32], strides = [1, 1]} : vector<1x96xf32> to vector<1x32xf32>
    %73 = math.tanh %71 : vector<1x32xf32>
    %74 = arith.mulf %72, %73 : vector<1x32xf32>
    %75 = vector.extract_strided_slice %74 {offsets = [0, 0], sizes = [1, 16], strides = [1, 1]} : vector<1x32xf32> to vector<1x16xf32>
    %c2_28 = arith.constant 2 : index
    %c0_29 = arith.constant 0 : index
    %76 = vector.load %arg15[%c2_28, %c0_29] : memref<8x32xf32, #tpu.memory_space<vmem>>, vector<1x16xf32>
    tpu.vector_store %arg15[%c2_28, %c0_29], %75 {strides = array<i32>} : memref<8x32xf32, #tpu.memory_space<vmem>>, vector<1x16xf32>,
    %77 = vector.extract_strided_slice %74 {offsets = [0, 16], sizes = [1, 16], strides = [1, 1]} : vector<1x32xf32> to vector<1x16xf32>
    %c5 = arith.constant 5 : index
    %c16_30 = arith.constant 16 : index
    %78 = vector.load %arg15[%c5, %c16_30] : memref<8x32xf32, #tpu.memory_space<vmem>>, vector<1x16xf32>
    tpu.vector_store %arg15[%c5, %c16_30], %77 {strides = array<i32>} : memref<8x32xf32, #tpu.memory_space<vmem>>, vector<1x16xf32>,
    %c3 = arith.constant 3 : index
    %c0_31 = arith.constant 0 : index
    %79 = vector.load %arg14[%c3, %c0_31] : memref<8x128xf32, #tpu.memory_space<vmem>>, vector<1x128xf32>
    %cst_32 = arith.constant dense<0.000000e+00> : vector<1x128xf32>
    %80 = tpu.matmul %74, %7, %cst_32 {dimension_numbers = #tpu.dot_dimension_numbers<[1], [0], [0], [1], [0, 0, 1, 1], [], []>} : vector<1x32xf32>, vector<32x128xf32>, vector<1x128xf32> -> vector<1x128xf32>
    %81 = arith.addf %79, %80 : vector<1x128xf32>
    %82 = vector.extract_strided_slice %81 {offsets = [0, 0], sizes = [1, 96], strides = [1, 1]} : vector<1x128xf32> to vector<1x96xf32>
    %83 = arith.negf %82 : vector<1x96xf32>
    %84 = math.exp %83 : vector<1x96xf32>
    %cst_33 = arith.constant 1.000000e+00 : f32
    %85 = vector.broadcast %cst_33 : f32 to vector<1x96xf32>
    %86 = arith.addf %85, %84 : vector<1x96xf32>
    %87 = arith.divf %85, %86 : vector<1x96xf32>
    %88 = vector.extract_strided_slice %81 {offsets = [0, 96], sizes = [1, 32], strides = [1, 1]} : vector<1x128xf32> to vector<1x32xf32>
    %89 = math.tanh %88 : vector<1x32xf32>
    %90 = vector.extract_strided_slice %87 {offsets = [0, 32], sizes = [1, 32], strides = [1, 1]} : vector<1x96xf32> to vector<1x32xf32>
    %91 = arith.mulf %90, %71 : vector<1x32xf32>
    %92 = vector.extract_strided_slice %87 {offsets = [0, 0], sizes = [1, 32], strides = [1, 1]} : vector<1x96xf32> to vector<1x32xf32>
    %93 = arith.mulf %92, %89 : vector<1x32xf32>
    %94 = arith.addf %91, %93 : vector<1x32xf32>
    %95 = vector.extract_strided_slice %87 {offsets = [0, 64], sizes = [1, 32], strides = [1, 1]} : vector<1x96xf32> to vector<1x32xf32>
    %96 = math.tanh %94 : vector<1x32xf32>
    %97 = arith.mulf %95, %96 : vector<1x32xf32>
    %98 = vector.extract_strided_slice %97 {offsets = [0, 0], sizes = [1, 16], strides = [1, 1]} : vector<1x32xf32> to vector<1x16xf32>
    %c3_34 = arith.constant 3 : index
    %c0_35 = arith.constant 0 : index
    %99 = vector.load %arg15[%c3_34, %c0_35] : memref<8x32xf32, #tpu.memory_space<vmem>>, vector<1x16xf32>
    tpu.vector_store %arg15[%c3_34, %c0_35], %98 {strides = array<i32>} : memref<8x32xf32, #tpu.memory_space<vmem>>, vector<1x16xf32>,
    %100 = vector.extract_strided_slice %97 {offsets = [0, 16], sizes = [1, 16], strides = [1, 1]} : vector<1x32xf32> to vector<1x16xf32>
    %c4 = arith.constant 4 : index
    %c16_36 = arith.constant 16 : index
    %101 = vector.load %arg15[%c4, %c16_36] : memref<8x32xf32, #tpu.memory_space<vmem>>, vector<1x16xf32>
    tpu.vector_store %arg15[%c4, %c16_36], %100 {strides = array<i32>} : memref<8x32xf32, #tpu.memory_space<vmem>>, vector<1x16xf32>,
    %c4_37 = arith.constant 4 : index
    %c0_38 = arith.constant 0 : index
    %102 = vector.load %arg14[%c4_37, %c0_38] : memref<8x128xf32, #tpu.memory_space<vmem>>, vector<1x128xf32>
    %cst_39 = arith.constant dense<0.000000e+00> : vector<1x128xf32>
    %103 = tpu.matmul %97, %7, %cst_39 {dimension_numbers = #tpu.dot_dimension_numbers<[1], [0], [0], [1], [0, 0, 1, 1], [], []>} : vector<1x32xf32>, vector<32x128xf32>, vector<1x128xf32> -> vector<1x128xf32>
    %104 = arith.addf %102, %103 : vector<1x128xf32>
    %105 = vector.extract_strided_slice %104 {offsets = [0, 0], sizes = [1, 96], strides = [1, 1]} : vector<1x128xf32> to vector<1x96xf32>
    %106 = arith.negf %105 : vector<1x96xf32>
    %107 = math.exp %106 : vector<1x96xf32>
    %cst_40 = arith.constant 1.000000e+00 : f32
    %108 = vector.broadcast %cst_40 : f32 to vector<1x96xf32>
    %109 = arith.addf %108, %107 : vector<1x96xf32>
    %110 = arith.divf %108, %109 : vector<1x96xf32>
    %111 = vector.extract_strided_slice %104 {offsets = [0, 96], sizes = [1, 32], strides = [1, 1]} : vector<1x128xf32> to vector<1x32xf32>
    %112 = math.tanh %111 : vector<1x32xf32>
    %113 = vector.extract_strided_slice %110 {offsets = [0, 32], sizes = [1, 32], strides = [1, 1]} : vector<1x96xf32> to vector<1x32xf32>
    %114 = arith.mulf %113, %94 : vector<1x32xf32>
    %115 = vector.extract_strided_slice %110 {offsets = [0, 0], sizes = [1, 32], strides = [1, 1]} : vector<1x96xf32> to vector<1x32xf32>
    %116 = arith.mulf %115, %112 : vector<1x32xf32>
    %117 = arith.addf %114, %116 : vector<1x32xf32>
    %118 = vector.extract_strided_slice %110 {offsets = [0, 64], sizes = [1, 32], strides = [1, 1]} : vector<1x96xf32> to vector<1x32xf32>
    %119 = math.tanh %117 : vector<1x32xf32>
    %120 = arith.mulf %118, %119 : vector<1x32xf32>
    %121 = vector.extract_strided_slice %120 {offsets = [0, 0], sizes = [1, 16], strides = [1, 1]} : vector<1x32xf32> to vector<1x16xf32>
    %c4_41 = arith.constant 4 : index
    %c0_42 = arith.constant 0 : index
    %122 = vector.load %arg15[%c4_41, %c0_42] : memref<8x32xf32, #tpu.memory_space<vmem>>, vector<1x16xf32>
    tpu.vector_store %arg15[%c4_41, %c0_42], %121 {strides = array<i32>} : memref<8x32xf32, #tpu.memory_space<vmem>>, vector<1x16xf32>,
    %123 = vector.extract_strided_slice %120 {offsets = [0, 16], sizes = [1, 16], strides = [1, 1]} : vector<1x32xf32> to vector<1x16xf32>
    %c3_43 = arith.constant 3 : index
    %c16_44 = arith.constant 16 : index
    %124 = vector.load %arg15[%c3_43, %c16_44] : memref<8x32xf32, #tpu.memory_space<vmem>>, vector<1x16xf32>
    tpu.vector_store %arg15[%c3_43, %c16_44], %123 {strides = array<i32>} : memref<8x32xf32, #tpu.memory_space<vmem>>, vector<1x16xf32>,
    %c5_45 = arith.constant 5 : index
    %c0_46 = arith.constant 0 : index
    %125 = vector.load %arg14[%c5_45, %c0_46] : memref<8x128xf32, #tpu.memory_space<vmem>>, vector<1x128xf32>
    %cst_47 = arith.constant dense<0.000000e+00> : vector<1x128xf32>
    %126 = tpu.matmul %120, %7, %cst_47 {dimension_numbers = #tpu.dot_dimension_numbers<[1], [0], [0], [1], [0, 0, 1, 1], [], []>} : vector<1x32xf32>, vector<32x128xf32>, vector<1x128xf32> -> vector<1x128xf32>
    %127 = arith.addf %125, %126 : vector<1x128xf32>
    %128 = vector.extract_strided_slice %127 {offsets = [0, 0], sizes = [1, 96], strides = [1, 1]} : vector<1x128xf32> to vector<1x96xf32>
    %129 = arith.negf %128 : vector<1x96xf32>
    %130 = math.exp %129 : vector<1x96xf32>
    %cst_48 = arith.constant 1.000000e+00 : f32
    %131 = vector.broadcast %cst_48 : f32 to vector<1x96xf32>
    %132 = arith.addf %131, %130 : vector<1x96xf32>
    %133 = arith.divf %131, %132 : vector<1x96xf32>
    %134 = vector.extract_strided_slice %127 {offsets = [0, 96], sizes = [1, 32], strides = [1, 1]} : vector<1x128xf32> to vector<1x32xf32>
    %135 = math.tanh %134 : vector<1x32xf32>
    %136 = vector.extract_strided_slice %133 {offsets = [0, 32], sizes = [1, 32], strides = [1, 1]} : vector<1x96xf32> to vector<1x32xf32>
    %137 = arith.mulf %136, %117 : vector<1x32xf32>
    %138 = vector.extract_strided_slice %133 {offsets = [0, 0], sizes = [1, 32], strides = [1, 1]} : vector<1x96xf32> to vector<1x32xf32>
    %139 = arith.mulf %138, %135 : vector<1x32xf32>
    %140 = arith.addf %137, %139 : vector<1x32xf32>
    %141 = vector.extract_strided_slice %133 {offsets = [0, 64], sizes = [1, 32], strides = [1, 1]} : vector<1x96xf32> to vector<1x32xf32>
    %142 = math.tanh %140 : vector<1x32xf32>
    %143 = arith.mulf %141, %142 : vector<1x32xf32>
    %144 = vector.extract_strided_slice %143 {offsets = [0, 0], sizes = [1, 16], strides = [1, 1]} : vector<1x32xf32> to vector<1x16xf32>
    %c5_49 = arith.constant 5 : index
    %c0_50 = arith.constant 0 : index
    %145 = vector.load %arg15[%c5_49, %c0_50] : memref<8x32xf32, #tpu.memory_space<vmem>>, vector<1x16xf32>
    tpu.vector_store %arg15[%c5_49, %c0_50], %144 {strides = array<i32>} : memref<8x32xf32, #tpu.memory_space<vmem>>, vector<1x16xf32>,
    %146 = vector.extract_strided_slice %143 {offsets = [0, 16], sizes = [1, 16], strides = [1, 1]} : vector<1x32xf32> to vector<1x16xf32>
    %c2_51 = arith.constant 2 : index
    %c16_52 = arith.constant 16 : index
    %147 = vector.load %arg15[%c2_51, %c16_52] : memref<8x32xf32, #tpu.memory_space<vmem>>, vector<1x16xf32>
    tpu.vector_store %arg15[%c2_51, %c16_52], %146 {strides = array<i32>} : memref<8x32xf32, #tpu.memory_space<vmem>>, vector<1x16xf32>,
    %c6_53 = arith.constant 6 : index
    %c0_54 = arith.constant 0 : index
    %148 = vector.load %arg14[%c6_53, %c0_54] : memref<8x128xf32, #tpu.memory_space<vmem>>, vector<1x128xf32>
    %cst_55 = arith.constant dense<0.000000e+00> : vector<1x128xf32>
    %149 = tpu.matmul %143, %7, %cst_55 {dimension_numbers = #tpu.dot_dimension_numbers<[1], [0], [0], [1], [0, 0, 1, 1], [], []>} : vector<1x32xf32>, vector<32x128xf32>, vector<1x128xf32> -> vector<1x128xf32>
    %150 = arith.addf %148, %149 : vector<1x128xf32>
    %151 = vector.extract_strided_slice %150 {offsets = [0, 0], sizes = [1, 96], strides = [1, 1]} : vector<1x128xf32> to vector<1x96xf32>
    %152 = arith.negf %151 : vector<1x96xf32>
    %153 = math.exp %152 : vector<1x96xf32>
    %cst_56 = arith.constant 1.000000e+00 : f32
    %154 = vector.broadcast %cst_56 : f32 to vector<1x96xf32>
    %155 = arith.addf %154, %153 : vector<1x96xf32>
    %156 = arith.divf %154, %155 : vector<1x96xf32>
    %157 = vector.extract_strided_slice %150 {offsets = [0, 96], sizes = [1, 32], strides = [1, 1]} : vector<1x128xf32> to vector<1x32xf32>
    %158 = math.tanh %157 : vector<1x32xf32>
    %159 = vector.extract_strided_slice %156 {offsets = [0, 32], sizes = [1, 32], strides = [1, 1]} : vector<1x96xf32> to vector<1x32xf32>
    %160 = arith.mulf %159, %140 : vector<1x32xf32>
    %161 = vector.extract_strided_slice %156 {offsets = [0, 0], sizes = [1, 32], strides = [1, 1]} : vector<1x96xf32> to vector<1x32xf32>
    %162 = arith.mulf %161, %158 : vector<1x32xf32>
    %163 = arith.addf %160, %162 : vector<1x32xf32>
    %164 = vector.extract_strided_slice %156 {offsets = [0, 64], sizes = [1, 32], strides = [1, 1]} : vector<1x96xf32> to vector<1x32xf32>
    %165 = math.tanh %163 : vector<1x32xf32>
    %166 = arith.mulf %164, %165 : vector<1x32xf32>
    %167 = vector.extract_strided_slice %166 {offsets = [0, 0], sizes = [1, 16], strides = [1, 1]} : vector<1x32xf32> to vector<1x16xf32>
    %c6_57 = arith.constant 6 : index
    %c0_58 = arith.constant 0 : index
    %168 = vector.load %arg15[%c6_57, %c0_58] : memref<8x32xf32, #tpu.memory_space<vmem>>, vector<1x16xf32>
    tpu.vector_store %arg15[%c6_57, %c0_58], %167 {strides = array<i32>} : memref<8x32xf32, #tpu.memory_space<vmem>>, vector<1x16xf32>,
    %169 = vector.extract_strided_slice %166 {offsets = [0, 16], sizes = [1, 16], strides = [1, 1]} : vector<1x32xf32> to vector<1x16xf32>
    %c1_59 = arith.constant 1 : index
    %c16_60 = arith.constant 16 : index
    %170 = vector.load %arg15[%c1_59, %c16_60] : memref<8x32xf32, #tpu.memory_space<vmem>>, vector<1x16xf32>
    tpu.vector_store %arg15[%c1_59, %c16_60], %169 {strides = array<i32>} : memref<8x32xf32, #tpu.memory_space<vmem>>, vector<1x16xf32>,
    %c7_61 = arith.constant 7 : index
    %c0_62 = arith.constant 0 : index
    %171 = vector.load %arg14[%c7_61, %c0_62] : memref<8x128xf32, #tpu.memory_space<vmem>>, vector<1x128xf32>
    %cst_63 = arith.constant dense<0.000000e+00> : vector<1x128xf32>
    %172 = tpu.matmul %166, %7, %cst_63 {dimension_numbers = #tpu.dot_dimension_numbers<[1], [0], [0], [1], [0, 0, 1, 1], [], []>} : vector<1x32xf32>, vector<32x128xf32>, vector<1x128xf32> -> vector<1x128xf32>
    %173 = arith.addf %171, %172 : vector<1x128xf32>
    %174 = vector.extract_strided_slice %173 {offsets = [0, 0], sizes = [1, 96], strides = [1, 1]} : vector<1x128xf32> to vector<1x96xf32>
    %175 = arith.negf %174 : vector<1x96xf32>
    %176 = math.exp %175 : vector<1x96xf32>
    %cst_64 = arith.constant 1.000000e+00 : f32
    %177 = vector.broadcast %cst_64 : f32 to vector<1x96xf32>
    %178 = arith.addf %177, %176 : vector<1x96xf32>
    %179 = arith.divf %177, %178 : vector<1x96xf32>
    %180 = vector.extract_strided_slice %173 {offsets = [0, 96], sizes = [1, 32], strides = [1, 1]} : vector<1x128xf32> to vector<1x32xf32>
    %181 = math.tanh %180 : vector<1x32xf32>
    %182 = vector.extract_strided_slice %179 {offsets = [0, 32], sizes = [1, 32], strides = [1, 1]} : vector<1x96xf32> to vector<1x32xf32>
    %183 = arith.mulf %182, %163 : vector<1x32xf32>
    %184 = vector.extract_strided_slice %179 {offsets = [0, 0], sizes = [1, 32], strides = [1, 1]} : vector<1x96xf32> to vector<1x32xf32>
    %185 = arith.mulf %184, %181 : vector<1x32xf32>
    %186 = arith.addf %183, %185 : vector<1x32xf32>
    %187 = vector.extract_strided_slice %179 {offsets = [0, 64], sizes = [1, 32], strides = [1, 1]} : vector<1x96xf32> to vector<1x32xf32>
    %188 = math.tanh %186 : vector<1x32xf32>
    %189 = arith.mulf %187, %188 : vector<1x32xf32>
    %190 = vector.extract_strided_slice %189 {offsets = [0, 0], sizes = [1, 16], strides = [1, 1]} : vector<1x32xf32> to vector<1x16xf32>
    %c7_65 = arith.constant 7 : index
    %c0_66 = arith.constant 0 : index
    %191 = vector.load %arg15[%c7_65, %c0_66] : memref<8x32xf32, #tpu.memory_space<vmem>>, vector<1x16xf32>
    tpu.vector_store %arg15[%c7_65, %c0_66], %190 {strides = array<i32>} : memref<8x32xf32, #tpu.memory_space<vmem>>, vector<1x16xf32>,
    %192 = vector.extract_strided_slice %189 {offsets = [0, 16], sizes = [1, 16], strides = [1, 1]} : vector<1x32xf32> to vector<1x16xf32>
    %c0_67 = arith.constant 0 : index
    %c16_68 = arith.constant 16 : index
    %193 = vector.load %arg15[%c0_67, %c16_68] : memref<8x32xf32, #tpu.memory_space<vmem>>, vector<1x16xf32>
    tpu.vector_store %arg15[%c0_67, %c16_68], %192 {strides = array<i32>} : memref<8x32xf32, #tpu.memory_space<vmem>>, vector<1x16xf32>,
    %c0_69 = arith.constant 0 : index
    %c0_70 = arith.constant 0 : index
    %194 = vector.load %arg15[%c0_69, %c0_70] : memref<8x32xf32, #tpu.memory_space<vmem>>, vector<8x32xf32>
    %c0_71 = arith.constant 0 : index
    %c0_72 = arith.constant 0 : index
    %195 = vector.load %arg6[%c0_71, %c0_72] : memref<32x6xf32, #tpu.memory_space<vmem>>, vector<32x6xf32>
    %cst_73 = arith.constant dense<0.000000e+00> : vector<8x6xf32>
    %196 = tpu.matmul %194, %195, %cst_73 {dimension_numbers = #tpu.dot_dimension_numbers<[1], [0], [0], [1], [0, 0, 1, 1], [], []>} : vector<8x32xf32>, vector<32x6xf32>, vector<8x6xf32> -> vector<8x6xf32>
    %c0_74 = arith.constant 0 : index
    %c0_75 = arith.constant 0 : index
    %197 = vector.load %arg7[%c0_74, %c0_75] : memref<1x6xf32, #tpu.memory_space<vmem>>, vector<1x6xf32>
    %198 = vector.broadcast %197 : vector<1x6xf32> to vector<8x6xf32>
    %199 = arith.addf %196, %198 : vector<8x6xf32>
    %c0_76 = arith.constant 0 : index
    %c0_77 = arith.constant 0 : index
    %200 = vector.load %arg8[%c0_76, %c0_77] : memref<6x32xf32, #tpu.memory_space<vmem>>, vector<6x32xf32>
    %cst_78 = arith.constant dense<0.000000e+00> : vector<6x8xf32>
    %201 = tpu.matmul %200, %194, %cst_78 {dimension_numbers = #tpu.dot_dimension_numbers<[1], [1], [0], [0], [0, 0, 1, 0], [], []>} : vector<6x32xf32>, vector<8x32xf32>, vector<6x8xf32> -> vector<6x8xf32>
    %c0_79 = arith.constant 0 : index
    %c0_80 = arith.constant 0 : index
    %202 = vector.load %arg9[%c0_79, %c0_80] : memref<6x1xf32, #tpu.memory_space<vmem>>, vector<6x1xf32>
    %203 = vector.broadcast %202 : vector<6x1xf32> to vector<6x8xf32>
    %204 = arith.addf %201, %203 : vector<6x8xf32>
    %c0_81 = arith.constant 0 : index
    %c0_82 = arith.constant 0 : index
    %205 = vector.load %arg10[%c0_81, %c0_82] : memref<7x7xf32, #tpu.memory_space<vmem>>, vector<7x7xf32>
    %206 = vector.extract_strided_slice %205 {offsets = [0, 0], sizes = [6, 6], strides = [1, 1]} : vector<7x7xf32> to vector<6x6xf32>
    %c0_83 = arith.constant 0 : index
    %c0_84 = arith.constant 0 : index
    %207 = vector.load %arg11[%c0_83, %c0_84] : memref<7x7xf32, #tpu.memory_space<vmem>>, vector<7x7xf32>
    %208 = vector.extract_strided_slice %207 {offsets = [0, 0], sizes = [6, 6], strides = [1, 1]} : vector<7x7xf32> to vector<6x6xf32>
    %209 = tpu.iota {dimensions = array<i32: 0>} : vector<6x6xi32>
    %210 = tpu.iota {dimensions = array<i32: 1>} : vector<6x6xi32>
    %211 = tpu.iota {dimensions = array<i32: 1>} : vector<1x6xi32>
    %212 = tpu.iota {dimensions = array<i32: 0>} : vector<6x1xi32>
    %213 = vector.extract_strided_slice %205 {offsets = [6, 0], sizes = [1, 6], strides = [1, 1]} : vector<7x7xf32> to vector<1x6xf32>
    %214 = vector.extract_strided_slice %199 {offsets = [0, 0], sizes = [1, 6], strides = [1, 1]} : vector<8x6xf32> to vector<1x6xf32>
    %215 = arith.addf %213, %214 : vector<1x6xf32>
    %216 = vector.broadcast %215 : vector<1x6xf32> to vector<6x6xf32>
    %217 = arith.addf %208, %216 : vector<6x6xf32>
    %cst_85 = arith.constant dense<0xFF800000> : vector<6xf32>
    %218 = vector.multi_reduction <maximumf>, %217, %cst_85 [1] : vector<6x6xf32> to vector<6xf32>
    %219 = vector.shape_cast %218 : vector<6xf32> to vector<6x1xf32>
    %220 = vector.broadcast %219 : vector<6x1xf32> to vector<6x6xf32>
    %221 = arith.cmpf oeq, %217, %220 : vector<6x6xf32>
    %c6_i32 = arith.constant 6 : i32
    %222 = vector.broadcast %c6_i32 : i32 to vector<6x6xi32>
    %223 = arith.select %221, %210, %222 : vector<6x6xi1>, vector<6x6xi32>
    %cst_86 = arith.constant dense<2147483647> : vector<6xi32>
    %224 = vector.multi_reduction <minsi>, %223, %cst_86 [1] : vector<6x6xi32> to vector<6xi32>
    %225 = vector.shape_cast %224 : vector<6xi32> to vector<6x1xi32>
    %226 = vector.extract_strided_slice %204 {offsets = [0, 1], sizes = [6, 1], strides = [1, 1]} : vector<6x8xf32> to vector<6x1xf32>
    %227 = arith.addf %219, %226 : vector<6x1xf32>
    %228 = vector.broadcast %227 : vector<6x1xf32> to vector<6x6xf32>
    %229 = arith.addf %206, %228 : vector<6x6xf32>
    %cst_87 = arith.constant dense<0xFF800000> : vector<6xf32>
    %230 = vector.multi_reduction <maximumf>, %229, %cst_87 [0] : vector<6x6xf32> to vector<6xf32>
    %231 = vector.shape_cast %230 : vector<6xf32> to vector<1x6xf32>
    %232 = vector.broadcast %231 : vector<1x6xf32> to vector<6x6xf32>
    %233 = arith.cmpf oeq, %229, %232 : vector<6x6xf32>
    %c6_i32_88 = arith.constant 6 : i32
    %234 = vector.broadcast %c6_i32_88 : i32 to vector<6x6xi32>
    %235 = arith.select %233, %209, %234 : vector<6x6xi1>, vector<6x6xi32>
    %cst_89 = arith.constant dense<2147483647> : vector<6xi32>
    %236 = vector.multi_reduction <minsi>, %235, %cst_89 [0] : vector<6x6xi32> to vector<6xi32>
    %237 = vector.shape_cast %236 : vector<6xi32> to vector<1x6xi32>
    %238 = vector.extract_strided_slice %199 {offsets = [2, 0], sizes = [1, 6], strides = [1, 1]} : vector<8x6xf32> to vector<1x6xf32>
    %239 = arith.addf %231, %238 : vector<1x6xf32>
    %240 = vector.broadcast %239 : vector<1x6xf32> to vector<6x6xf32>
    %241 = arith.addf %208, %240 : vector<6x6xf32>
    %cst_90 = arith.constant dense<0xFF800000> : vector<6xf32>
    %242 = vector.multi_reduction <maximumf>, %241, %cst_90 [1] : vector<6x6xf32> to vector<6xf32>
    %243 = vector.shape_cast %242 : vector<6xf32> to vector<6x1xf32>
    %244 = vector.broadcast %243 : vector<6x1xf32> to vector<6x6xf32>
    %245 = arith.cmpf oeq, %241, %244 : vector<6x6xf32>
    %c6_i32_91 = arith.constant 6 : i32
    %246 = vector.broadcast %c6_i32_91 : i32 to vector<6x6xi32>
    %247 = arith.select %245, %210, %246 : vector<6x6xi1>, vector<6x6xi32>
    %cst_92 = arith.constant dense<2147483647> : vector<6xi32>
    %248 = vector.multi_reduction <minsi>, %247, %cst_92 [1] : vector<6x6xi32> to vector<6xi32>
    %249 = vector.shape_cast %248 : vector<6xi32> to vector<6x1xi32>
    %250 = vector.extract_strided_slice %204 {offsets = [0, 3], sizes = [6, 1], strides = [1, 1]} : vector<6x8xf32> to vector<6x1xf32>
    %251 = arith.addf %243, %250 : vector<6x1xf32>
    %252 = vector.broadcast %251 : vector<6x1xf32> to vector<6x6xf32>
    %253 = arith.addf %206, %252 : vector<6x6xf32>
    %cst_93 = arith.constant dense<0xFF800000> : vector<6xf32>
    %254 = vector.multi_reduction <maximumf>, %253, %cst_93 [0] : vector<6x6xf32> to vector<6xf32>
    %255 = vector.shape_cast %254 : vector<6xf32> to vector<1x6xf32>
    %256 = vector.broadcast %255 : vector<1x6xf32> to vector<6x6xf32>
    %257 = arith.cmpf oeq, %253, %256 : vector<6x6xf32>
    %c6_i32_94 = arith.constant 6 : i32
    %258 = vector.broadcast %c6_i32_94 : i32 to vector<6x6xi32>
    %259 = arith.select %257, %209, %258 : vector<6x6xi1>, vector<6x6xi32>
    %cst_95 = arith.constant dense<2147483647> : vector<6xi32>
    %260 = vector.multi_reduction <minsi>, %259, %cst_95 [0] : vector<6x6xi32> to vector<6xi32>
    %261 = vector.shape_cast %260 : vector<6xi32> to vector<1x6xi32>
    %262 = vector.extract_strided_slice %199 {offsets = [4, 0], sizes = [1, 6], strides = [1, 1]} : vector<8x6xf32> to vector<1x6xf32>
    %263 = arith.addf %255, %262 : vector<1x6xf32>
    %264 = vector.broadcast %263 : vector<1x6xf32> to vector<6x6xf32>
    %265 = arith.addf %208, %264 : vector<6x6xf32>
    %cst_96 = arith.constant dense<0xFF800000> : vector<6xf32>
    %266 = vector.multi_reduction <maximumf>, %265, %cst_96 [1] : vector<6x6xf32> to vector<6xf32>
    %267 = vector.shape_cast %266 : vector<6xf32> to vector<6x1xf32>
    %268 = vector.broadcast %267 : vector<6x1xf32> to vector<6x6xf32>
    %269 = arith.cmpf oeq, %265, %268 : vector<6x6xf32>
    %c6_i32_97 = arith.constant 6 : i32
    %270 = vector.broadcast %c6_i32_97 : i32 to vector<6x6xi32>
    %271 = arith.select %269, %210, %270 : vector<6x6xi1>, vector<6x6xi32>
    %cst_98 = arith.constant dense<2147483647> : vector<6xi32>
    %272 = vector.multi_reduction <minsi>, %271, %cst_98 [1] : vector<6x6xi32> to vector<6xi32>
    %273 = vector.shape_cast %272 : vector<6xi32> to vector<6x1xi32>
    %274 = vector.extract_strided_slice %204 {offsets = [0, 5], sizes = [6, 1], strides = [1, 1]} : vector<6x8xf32> to vector<6x1xf32>
    %275 = arith.addf %267, %274 : vector<6x1xf32>
    %276 = vector.broadcast %275 : vector<6x1xf32> to vector<6x6xf32>
    %277 = arith.addf %206, %276 : vector<6x6xf32>
    %cst_99 = arith.constant dense<0xFF800000> : vector<6xf32>
    %278 = vector.multi_reduction <maximumf>, %277, %cst_99 [0] : vector<6x6xf32> to vector<6xf32>
    %279 = vector.shape_cast %278 : vector<6xf32> to vector<1x6xf32>
    %280 = vector.broadcast %279 : vector<1x6xf32> to vector<6x6xf32>
    %281 = arith.cmpf oeq, %277, %280 : vector<6x6xf32>
    %c6_i32_100 = arith.constant 6 : i32
    %282 = vector.broadcast %c6_i32_100 : i32 to vector<6x6xi32>
    %283 = arith.select %281, %209, %282 : vector<6x6xi1>, vector<6x6xi32>
    %cst_101 = arith.constant dense<2147483647> : vector<6xi32>
    %284 = vector.multi_reduction <minsi>, %283, %cst_101 [0] : vector<6x6xi32> to vector<6xi32>
    %285 = vector.shape_cast %284 : vector<6xi32> to vector<1x6xi32>
    %286 = vector.extract_strided_slice %199 {offsets = [6, 0], sizes = [1, 6], strides = [1, 1]} : vector<8x6xf32> to vector<1x6xf32>
    %287 = arith.addf %279, %286 : vector<1x6xf32>
    %288 = vector.broadcast %287 : vector<1x6xf32> to vector<6x6xf32>
    %289 = arith.addf %208, %288 : vector<6x6xf32>
    %cst_102 = arith.constant dense<0xFF800000> : vector<6xf32>
    %290 = vector.multi_reduction <maximumf>, %289, %cst_102 [1] : vector<6x6xf32> to vector<6xf32>
    %291 = vector.shape_cast %290 : vector<6xf32> to vector<6x1xf32>
    %292 = vector.broadcast %291 : vector<6x1xf32> to vector<6x6xf32>
    %293 = arith.cmpf oeq, %289, %292 : vector<6x6xf32>
    %c6_i32_103 = arith.constant 6 : i32
    %294 = vector.broadcast %c6_i32_103 : i32 to vector<6x6xi32>
    %295 = arith.select %293, %210, %294 : vector<6x6xi1>, vector<6x6xi32>
    %cst_104 = arith.constant dense<2147483647> : vector<6xi32>
    %296 = vector.multi_reduction <minsi>, %295, %cst_104 [1] : vector<6x6xi32> to vector<6xi32>
    %297 = vector.shape_cast %296 : vector<6xi32> to vector<6x1xi32>
    %298 = vector.extract_strided_slice %204 {offsets = [0, 7], sizes = [6, 1], strides = [1, 1]} : vector<6x8xf32> to vector<6x1xf32>
    %299 = arith.addf %291, %298 : vector<6x1xf32>
    %cst_105 = arith.constant dense<0xFF800000> : vector<1xf32>
    %300 = vector.multi_reduction <maximumf>, %299, %cst_105 [0] : vector<6x1xf32> to vector<1xf32>
    %301 = vector.shape_cast %300 : vector<1xf32> to vector<1x1xf32>
    %302 = vector.broadcast %301 : vector<1x1xf32> to vector<6x1xf32>
    %303 = arith.cmpf oeq, %299, %302 : vector<6x1xf32>
    %c6_i32_106 = arith.constant 6 : i32
    %304 = vector.broadcast %c6_i32_106 : i32 to vector<6x1xi32>
    %305 = arith.select %303, %212, %304 : vector<6x1xi1>, vector<6x1xi32>
    %cst_107 = arith.constant dense<2147483647> : vector<1xi32>
    %306 = vector.multi_reduction <minsi>, %305, %cst_107 [0] : vector<6x1xi32> to vector<1xi32>
    %307 = vector.shape_cast %306 : vector<1xi32> to vector<1x1xi32>
    %c0_108 = arith.constant 0 : index
    %c0_109 = arith.constant 0 : index
    %308 = vector.load %arg12[%c0_108, %c0_109] : memref<1x1xf32, #tpu.memory_space<vmem>>, vector<1x1xf32>
    tpu.vector_store %arg12[%c0_108, %c0_109], %301 {strides = array<i32>} : memref<1x1xf32, #tpu.memory_space<vmem>>, vector<1x1xf32>,
    %309 = tpu.iota {dimensions = array<i32: 1>} : vector<1x8xi32>
    %c7_i32 = arith.constant 7 : i32
    %310 = vector.broadcast %c7_i32 : i32 to vector<1x8xi32>
    %311 = arith.cmpi eq, %309, %310 : vector<1x8xi32>
    %c0_i32 = arith.constant 0 : i32
    %312 = vector.shape_cast %307 : vector<1x1xi32> to vector<1x1xi32>
    %313 = vector.broadcast %312 : vector<1x1xi32> to vector<1x8xi32>
    %314 = vector.broadcast %c0_i32 : i32 to vector<1x8xi32>
    %315 = arith.select %311, %313, %314 : vector<1x8xi1>, vector<1x8xi32>
    %316 = vector.broadcast %307 : vector<1x1xi32> to vector<6x1xi32>
    %317 = arith.cmpi eq, %212, %316 : vector<6x1xi32>
    %c0_i32_110 = arith.constant 0 : i32
    %318 = vector.broadcast %c0_i32_110 : i32 to vector<6x1xi32>
    %319 = arith.select %317, %297, %318 : vector<6x1xi1>, vector<6x1xi32>
    %cst_111 = arith.constant dense<0> : vector<1xi32>
    %320 = vector.multi_reduction <add>, %319, %cst_111 [0] : vector<6x1xi32> to vector<1xi32>
    %321 = vector.shape_cast %320 : vector<1xi32> to vector<1x1xi32>
    %c6_i32_112 = arith.constant 6 : i32
    %322 = vector.broadcast %c6_i32_112 : i32 to vector<1x8xi32>
    %323 = arith.cmpi eq, %309, %322 : vector<1x8xi32>
    %324 = vector.shape_cast %321 : vector<1x1xi32> to vector<1x1xi32>
    %325 = vector.broadcast %324 : vector<1x1xi32> to vector<1x8xi32>
    %326 = arith.select %323, %325, %315 : vector<1x8xi1>, vector<1x8xi32>
    %327 = vector.broadcast %321 : vector<1x1xi32> to vector<1x6xi32>
    %328 = arith.cmpi eq, %211, %327 : vector<1x6xi32>
    %c0_i32_113 = arith.constant 0 : i32
    %329 = vector.broadcast %c0_i32_113 : i32 to vector<1x6xi32>
    %330 = arith.select %328, %285, %329 : vector<1x6xi1>, vector<1x6xi32>
    %cst_114 = arith.constant dense<0> : vector<1xi32>
    %331 = vector.multi_reduction <add>, %330, %cst_114 [1] : vector<1x6xi32> to vector<1xi32>
    %332 = vector.shape_cast %331 : vector<1xi32> to vector<1x1xi32>
    %c5_i32 = arith.constant 5 : i32
    %333 = vector.broadcast %c5_i32 : i32 to vector<1x8xi32>
    %334 = arith.cmpi eq, %309, %333 : vector<1x8xi32>
    %335 = vector.shape_cast %332 : vector<1x1xi32> to vector<1x1xi32>
    %336 = vector.broadcast %335 : vector<1x1xi32> to vector<1x8xi32>
    %337 = arith.select %334, %336, %326 : vector<1x8xi1>, vector<1x8xi32>
    %338 = vector.broadcast %332 : vector<1x1xi32> to vector<6x1xi32>
    %339 = arith.cmpi eq, %212, %338 : vector<6x1xi32>
    %c0_i32_115 = arith.constant 0 : i32
    %340 = vector.broadcast %c0_i32_115 : i32 to vector<6x1xi32>
    %341 = arith.select %339, %273, %340 : vector<6x1xi1>, vector<6x1xi32>
    %cst_116 = arith.constant dense<0> : vector<1xi32>
    %342 = vector.multi_reduction <add>, %341, %cst_116 [0] : vector<6x1xi32> to vector<1xi32>
    %343 = vector.shape_cast %342 : vector<1xi32> to vector<1x1xi32>
    %c4_i32 = arith.constant 4 : i32
    %344 = vector.broadcast %c4_i32 : i32 to vector<1x8xi32>
    %345 = arith.cmpi eq, %309, %344 : vector<1x8xi32>
    %346 = vector.shape_cast %343 : vector<1x1xi32> to vector<1x1xi32>
    %347 = vector.broadcast %346 : vector<1x1xi32> to vector<1x8xi32>
    %348 = arith.select %345, %347, %337 : vector<1x8xi1>, vector<1x8xi32>
    %349 = vector.broadcast %343 : vector<1x1xi32> to vector<1x6xi32>
    %350 = arith.cmpi eq, %211, %349 : vector<1x6xi32>
    %c0_i32_117 = arith.constant 0 : i32
    %351 = vector.broadcast %c0_i32_117 : i32 to vector<1x6xi32>
    %352 = arith.select %350, %261, %351 : vector<1x6xi1>, vector<1x6xi32>
    %cst_118 = arith.constant dense<0> : vector<1xi32>
    %353 = vector.multi_reduction <add>, %352, %cst_118 [1] : vector<1x6xi32> to vector<1xi32>
    %354 = vector.shape_cast %353 : vector<1xi32> to vector<1x1xi32>
    %c3_i32 = arith.constant 3 : i32
    %355 = vector.broadcast %c3_i32 : i32 to vector<1x8xi32>
    %356 = arith.cmpi eq, %309, %355 : vector<1x8xi32>
    %357 = vector.shape_cast %354 : vector<1x1xi32> to vector<1x1xi32>
    %358 = vector.broadcast %357 : vector<1x1xi32> to vector<1x8xi32>
    %359 = arith.select %356, %358, %348 : vector<1x8xi1>, vector<1x8xi32>
    %360 = vector.broadcast %354 : vector<1x1xi32> to vector<6x1xi32>
    %361 = arith.cmpi eq, %212, %360 : vector<6x1xi32>
    %c0_i32_119 = arith.constant 0 : i32
    %362 = vector.broadcast %c0_i32_119 : i32 to vector<6x1xi32>
    %363 = arith.select %361, %249, %362 : vector<6x1xi1>, vector<6x1xi32>
    %cst_120 = arith.constant dense<0> : vector<1xi32>
    %364 = vector.multi_reduction <add>, %363, %cst_120 [0] : vector<6x1xi32> to vector<1xi32>
    %365 = vector.shape_cast %364 : vector<1xi32> to vector<1x1xi32>
    %c2_i32 = arith.constant 2 : i32
    %366 = vector.broadcast %c2_i32 : i32 to vector<1x8xi32>
    %367 = arith.cmpi eq, %309, %366 : vector<1x8xi32>
    %368 = vector.shape_cast %365 : vector<1x1xi32> to vector<1x1xi32>
    %369 = vector.broadcast %368 : vector<1x1xi32> to vector<1x8xi32>
    %370 = arith.select %367, %369, %359 : vector<1x8xi1>, vector<1x8xi32>
    %371 = vector.broadcast %365 : vector<1x1xi32> to vector<1x6xi32>
    %372 = arith.cmpi eq, %211, %371 : vector<1x6xi32>
    %c0_i32_121 = arith.constant 0 : i32
    %373 = vector.broadcast %c0_i32_121 : i32 to vector<1x6xi32>
    %374 = arith.select %372, %237, %373 : vector<1x6xi1>, vector<1x6xi32>
    %cst_122 = arith.constant dense<0> : vector<1xi32>
    %375 = vector.multi_reduction <add>, %374, %cst_122 [1] : vector<1x6xi32> to vector<1xi32>
    %376 = vector.shape_cast %375 : vector<1xi32> to vector<1x1xi32>
    %c1_i32 = arith.constant 1 : i32
    %377 = vector.broadcast %c1_i32 : i32 to vector<1x8xi32>
    %378 = arith.cmpi eq, %309, %377 : vector<1x8xi32>
    %379 = vector.shape_cast %376 : vector<1x1xi32> to vector<1x1xi32>
    %380 = vector.broadcast %379 : vector<1x1xi32> to vector<1x8xi32>
    %381 = arith.select %378, %380, %370 : vector<1x8xi1>, vector<1x8xi32>
    %382 = vector.broadcast %376 : vector<1x1xi32> to vector<6x1xi32>
    %383 = arith.cmpi eq, %212, %382 : vector<6x1xi32>
    %c0_i32_123 = arith.constant 0 : i32
    %384 = vector.broadcast %c0_i32_123 : i32 to vector<6x1xi32>
    %385 = arith.select %383, %225, %384 : vector<6x1xi1>, vector<6x1xi32>
    %cst_124 = arith.constant dense<0> : vector<1xi32>
    %386 = vector.multi_reduction <add>, %385, %cst_124 [0] : vector<6x1xi32> to vector<1xi32>
    %387 = vector.shape_cast %386 : vector<1xi32> to vector<1x1xi32>
    %c0_i32_125 = arith.constant 0 : i32
    %388 = vector.broadcast %c0_i32_125 : i32 to vector<1x8xi32>
    %389 = arith.cmpi eq, %309, %388 : vector<1x8xi32>
    %390 = vector.shape_cast %387 : vector<1x1xi32> to vector<1x1xi32>
    %391 = vector.broadcast %390 : vector<1x1xi32> to vector<1x8xi32>
    %392 = arith.select %389, %391, %381 : vector<1x8xi1>, vector<1x8xi32>
    %c0_126 = arith.constant 0 : index
    %c0_127 = arith.constant 0 : index
    %393 = vector.load %arg13[%c0_126, %c0_127] : memref<1x8xi32, #tpu.memory_space<vmem>>, vector<1x8xi32>
    tpu.vector_store %arg13[%c0_126, %c0_127], %392 {strides = array<i32>} : memref<1x8xi32, #tpu.memory_space<vmem>>, vector<1x8xi32>,
    return
  }
}

</mosaic_0001>

<bundles_post_ra>
// kernel: bilstm_crf_forward.1
= control target key start
LH: loop header
LB: loop body
LE: loop exit
PB: predicated region body
PF: predicated region fallthrough
CT: control target
= control target key end

     0   :  { %19 = vsyncpa [#allocation5], 0  ;;  %v1881_v3 = vmov 0.0|0.0   ;;  %vm1882_vm0 = vmmov 0   ;;  %v1883_v6 = vmov 0.0   ;;  %s2333_s0 = inlined_call_operand.vmem [shape: f32[8,32], index: 0, kind: input, shape index: {}]   ;;  %s2334_s1 = inlined_call_operand.vmem [shape: f32[32,128], index: 1, kind: input, shape index: {}]   ;;  %s2335_s2 = inlined_call_operand.vmem [shape: f32[1,128], index: 2, kind: input, shape index: {}]   ;;  %s2336_s3 = inlined_call_operand.vmem [shape: f32[32,128], index: 3, kind: input, shape index: {}]   ;;  %s2337_s4 = inlined_call_operand.vmem [shape: f32[1,32], index: 4, kind: input, shape index: {}]   ;;  %s2338_s5 = inlined_call_operand.vmem [shape: f32[1,32], index: 5, kind: input, shape index: {}]   ;;  %s2339_s6 = inlined_call_operand.vmem [shape: f32[32,6], index: 6, kind: input, shape index: {}]   ;;  %s2340_s7 = inlined_call_operand.vmem [shape: f32[1,6], index: 7, kind: input, shape index: {}]   ;;  %s2341_s8 = inlined_call_operand.vmem [shape: f32[6,32], index: 8, kind: input, shape index: {}]   ;;  %s2342_s9 = inlined_call_operand.vmem [shape: f32[6,1], index: 9, kind: input, shape index: {}]   ;;  %s2343_s10 = inlined_call_operand.vmem [shape: f32[7,7], index: 10, kind: input, shape index: {}]   ;;  %s2344_s11 = inlined_call_operand.vmem [shape: f32[7,7], index: 11, kind: input, shape index: {}]   ;;  %s2345_s12 = inlined_call_operand.hbm [shape: f32[1,1], index: 12, kind: output, shape index: {0}]   ;;  %s2346_s13 = inlined_call_operand.hbm [shape: s32[1,8], index: 13, kind: output, shape index: {1}]  }
   0x1   :  { %v46_v0 = vld [vmem:[%s2334_s1] sm:$0xff]  ;;  %v47_v1 = vld [vmem:[%s2334_s1 + $0x8] sm:$0xff]  ;;  %v48_v2 = vld [vmem:[%s2334_s1 + $0x10] sm:$0xff]  ;;  %1690 = vmatprep.subr.bf16.mxu0 %v1881_v3  ;;  %1583 = vmatprep.mubr.msk.f32.mxu0 %vm1882_vm0, %v1883_v6 }
   0x2   :  { %v1691_v4 = vpack.c.bf16 %v47_v1, %v46_v0  ;;  %v49_v5 = vld [vmem:[%s2334_s1 + $0x18] sm:$0xff]  ;;  %v132_v7 = vld [vmem:[%s2336_s3] sm:$0xff]  ;;  %1696 = vmatprep.subr.bf16.mxu1 %v1881_v3  ;;  %v133_v8 = vld [vmem:[%s2336_s3 + $0x8] sm:$0xff]  ;;  %1594 = vmatprep.mubr.msk.f32.mxu1 %vm1882_vm0, %v1883_v6 }
   0x3   :  { %v134_v9 = vld [vmem:[%s2336_s3 + $0x10] sm:$0xff]  ;;  %v135_v10 = vld [vmem:[%s2336_s3 + $0x18] sm:$0xff]  ;;  %v1694_v11 = vpack.c.bf16 %v49_v5, %v48_v2  ;;  %v1994_v12 = vpack.c.bf16 %v133_v8, %v132_v7 }
   0x4   :  { %1692 = vmatpush3.bf16.msra.mxu0 %v1691_v4 }
   0x5   :  { %20 = vsyncpa [#allocation7], 0  ;;  %1693 = vmatprep.subr.bf16.mxu0 %v1881_v3  ;;  %1698 = vmatpush3.bf16.msra.mxu1 %v1994_v12  ;;  %v1998_v13 = vpack.c.bf16 %v135_v10, %v134_v9  ;;  %v45_v14 = vld [vmem:[%s2333_s0] sm:$0xff]  ;;  %vm57_vm1 = vcmask 261120   ;;  %s1884_s26 = smov 32   ;;  %vm249_vm2 = vcmask 122880  }
   0x6   :  { %1699 = vmatprep.subr.bf16.mxu1 %v1881_v3  ;;  %v136_v15 = vld [vmem:[%s2337_s4] sm:$0x1]  ;;  %vm251_vm3 = vcmask 254080   ;;  %vm1161_vm4 = vcmask 46080   ;;  %vm1339_vm11 = vcmask 62520  }
   0x7   :  { %v1500_v16 = vld [vmem:[%s2335_s2] ss:$0 sm:$0xff]  ;;  %s1885_s2 = smov 64  }
   0x8   :  { %1695 = vmatpush3.bf16.msra.mxu0 %v1694_v11  ;;  %v1504_v25 = vld [vmem:[%s2338_s5] ss:$0 sm:$0xff] }
   0x9   :  { %1702 = vmatprep.subr.bf16.mxu0 %v1881_v3  ;;  %1701 = vmatpush3.bf16.msra.mxu1 %v1998_v13 }
   0xa   :  { %1708 = vmatprep.subr.bf16.mxu1 %v1881_v3 }
   0xb   :  { %1584 = vmatmul.mubr.msk.f32.vlgmr.msra.gmra.mrb[0].mxu0 %vm57_vm1, %v45_v14 }
   0xc   :  { %1704 = vmatpush3.bf16.msra.mxu0 %v1994_v12  ;;  %1605 = vmatprep.mubr.msk.f32.mxu0 %vm1882_vm0, %v1883_v6 }
   0xd   :  { %1595 = vmatmul.mubr.msk.f32.vlgmr.msra.gmra.mrb[0].mxu1 %vm57_vm1, %v136_v15  ;;  %1705 = vmatprep.subr.bf16.mxu0 %v1881_v3 }
   0xe   :  { %1710 = vmatpush3.bf16.msra.mxu1 %v1994_v12  ;;  %1616 = vmatprep.mubr.msk.f32.mxu1 %vm1882_vm0, %v1883_v6 }
   0xf   :  { %1711 = vmatprep.subr.bf16.mxu1 %v1881_v3 }
  0x10   :  { %1707 = vmatpush3.bf16.msra.mxu0 %v1998_v13 }
  0x11   :  { %1714 = vmatprep.subr.bf16.mxu0 %v1881_v3 }
  0x12   :  { %1713 = vmatpush3.bf16.msra.mxu1 %v1998_v13 }
  0x13   :  { %1720 = vmatprep.subr.bf16.mxu1 %v1881_v3 }
  0xde   :  { %v127_v17 = vpop.f32.mrb[0].mxu0 }
  0xdf   :  { %v128_v18 = vadd.f32 %v1500_v16, %v127_v17  ;;  %v1585_v19 = vpop.f32.mrb[1].mxu0 }
  0xe0   :  { %v208_v20 = vpop.f32.mrb[0].mxu1 }
  0xe1   :  { %131 = vst [vmem:[#allocation2] sm:$0xff] %v128_v18  ;;  %v1596_v21 = vpop.f32.mrb[1].mxu1 }
  0xe8   :  { %v138_v22 = vld [vmem:[#allocation2] sm:$0x1]  ;;  %v253_v40 = vld [vmem:[#allocation2 + $0x1] sm:$0x1]  ;;  %v357_v58 = vld [vmem:[#allocation2 + $0x2] sm:$0x1] }
  0xe9   :  { %v212_v23 = vadd.f32 %v208_v20, %v138_v22  ;;  %v461_v16 = vld [vmem:[#allocation2 + $0x3] sm:$0x1] }
  0xeb   :  { %1769 = vtanh.f32 %v212_v23  ;;  %v1503_v26 = vmul.f32 -1.442695, %v212_v23 }
  0xed   :  { %1771 = vpow2.f32 %v1503_v26 }
  0xf5   :  { %v1770_v24 = vpop.eup %1769 }
  0xf6   :  { %230 = vrot.lane.b32.xlu0 %v1770_v24, %s1884_s26 }
  0xf7   :  { %v1772_v27 = vpop.eup %1771 }
  0xf8   :  { %v216_v28 = vadd.f32 1.0, %v1772_v27 }
  0xfa   :  { %225 = vrot.lane.b32.xlu0 %v1504_v25, %s1884_s26  ;;  %1773 = vrcp.f32 %v216_v28 }
 0x104   :  { %v1774_v29 = vpop.eup %1773 }
 0x168   :  { %v231_v30 = vpop.permute.xlu0 %230 }
 0x169   :  { %v233_v31 = vmul.f32 %v1774_v29, %v231_v30 }
 0x16b   :  { %235 = vrot.lane.b32.xlu1 %v233_v31, %s1884_s26 }
 0x16c   :  { %v226_v32 = vpop.permute.xlu0 %225 }
 0x16d   :  { %v228_v33 = vmul.f32 %v1774_v29, %v226_v32 }
 0x1dd   :  { %v236_v34 = vpop.permute.xlu1 %235 }
 0x1de   :  { %v238_v35 = vadd.f32 %v236_v34, %v228_v33  ;;  %v565_v34 = vld [vmem:[#allocation2 + $0x4] sm:$0x1] }
 0x1e0   :  { %1775 = vtanh.f32 %v238_v35 }
 0x1ea   :  { %v1776_v36 = vpop.eup %1775 }
 0x1eb   :  { %241 = vrot.lane.b32.xlu1 %v1776_v36, %s1884_s26 }
 0x25d   :  { %v242_v37 = vpop.permute.xlu1 %241 }
 0x25e   :  { %v244_v38 = vmul.f32 %v1774_v29, %v242_v37 }
 0x260   :  { %246 = vrot.lane.b32.xlu0 %v244_v38, %s1885_s2 }
 0x2d2   :  { %v247_v39 = vpop.permute.xlu0 %246 }
 0x2d3   :  { %250 = vst.msk [vmem:[#allocation3] sm:$0x1] %vm249_vm2, %v247_v39  ;;  %1606 = vmatmul.mubr.msk.f32.vlgmr.msra.gmra.mrb[2].mxu0 %vm57_vm1, %v247_v39 }
 0x2d4   :  { %252 = vst.msk [vmem:[#allocation3 + $0x7] sm:$0x1] %vm251_vm3, %v247_v39  ;;  %1716 = vmatpush3.bf16.msra.mxu0 %v1994_v12  ;;  %1627 = vmatprep.mubr.msk.f32.mxu0 %vm1882_vm0, %v1883_v6 }
 0x2d5   :  { %1717 = vmatprep.subr.bf16.mxu0 %v1881_v3 }
 0x2d8   :  { %1719 = vmatpush3.bf16.msra.mxu0 %v1998_v13 }
 0x2d9   :  { %1726 = vmatprep.subr.bf16.mxu0 %v1881_v3 }
 0x3a6   :  { %v322_v41 = vpop.f32.mrb[2].mxu0 }
 0x3a7   :  { %v326_v42 = vadd.f32 %v322_v41, %v253_v40  ;;  %v1607_v43 = vpop.f32.mrb[3].mxu0 }
 0x3a9   :  { %1777 = vtanh.f32 %v326_v42  ;;  %v1506_v45 = vmul.f32 -1.442695, %v326_v42 }
 0x3ab   :  { %1779 = vpow2.f32 %v1506_v45 }
 0x3b3   :  { %v1778_v44 = vpop.eup %1777 }
 0x3b4   :  { %336 = vrot.lane.b32.xlu1 %v1778_v44, %s1884_s26 }
 0x3b5   :  { %v1780_v46 = vpop.eup %1779 }
 0x3b6   :  { %v330_v47 = vadd.f32 1.0, %v1780_v46 }
 0x3b8   :  { %1781 = vrcp.f32 %v330_v47 }
 0x3c2   :  { %v1782_v48 = vpop.eup %1781 }
 0x3c3   :  { %v334_v51 = vmul.f32 %v1782_v48, %v238_v35 }
 0x426   :  { %v337_v49 = vpop.permute.xlu1 %336 }
 0x427   :  { %v339_v50 = vmul.f32 %v1782_v48, %v337_v49 }
 0x429   :  { %341 = vrot.lane.b32.xlu0 %v339_v50, %s1884_s26 }
 0x49b   :  { %v342_v52 = vpop.permute.xlu0 %341 }
 0x49c   :  { %v344_v53 = vadd.f32 %v342_v52, %v334_v51  ;;  %v669_v52 = vld [vmem:[#allocation2 + $0x5] sm:$0x1] }
 0x49e   :  { %1783 = vtanh.f32 %v344_v53 }
 0x4a8   :  { %v1784_v54 = vpop.eup %1783 }
 0x4a9   :  { %347 = vrot.lane.b32.xlu1 %v1784_v54, %s1884_s26 }
 0x51b   :  { %v348_v55 = vpop.permute.xlu1 %347 }
 0x51c   :  { %v350_v56 = vmul.f32 %v1782_v48, %v348_v55 }
 0x51e   :  { %352 = vrot.lane.b32.xlu0 %v350_v56, %s1885_s2 }
 0x590   :  { %v353_v57 = vpop.permute.xlu0 %352 }
 0x591   :  { %355 = vst.msk [vmem:[#allocation3 + $0x1] sm:$0x1] %vm249_vm2, %v353_v57  ;;  %1617 = vmatmul.mubr.msk.f32.vlgmr.msra.gmra.mrb[2].mxu1 %vm57_vm1, %v353_v57 }
 0x592   :  { %356 = vst.msk [vmem:[#allocation3 + $0x6] sm:$0x1] %vm251_vm3, %v353_v57  ;;  %1722 = vmatpush3.bf16.msra.mxu1 %v1994_v12  ;;  %1638 = vmatprep.mubr.msk.f32.mxu1 %vm1882_vm0, %v1883_v6 }
 0x593   :  { %1723 = vmatprep.subr.bf16.mxu1 %v1881_v3 }
 0x596   :  { %1725 = vmatpush3.bf16.msra.mxu1 %v1998_v13 }
 0x597   :  { %1732 = vmatprep.subr.bf16.mxu1 %v1881_v3 }
 0x664   :  { %v426_v59 = vpop.f32.mrb[2].mxu1 }
 0x665   :  { %v430_v60 = vadd.f32 %v426_v59, %v357_v58  ;;  %v1618_v61 = vpop.f32.mrb[3].mxu1 }
 0x667   :  { %1785 = vtanh.f32 %v430_v60  ;;  %v1508_v63 = vmul.f32 -1.442695, %v430_v60 }
 0x669   :  { %1787 = vpow2.f32 %v1508_v63 }
 0x671   :  { %v1786_v62 = vpop.eup %1785 }
 0x672   :  { %440 = vrot.lane.b32.xlu1 %v1786_v62, %s1884_s26 }
 0x673   :  { %v1788_v0 = vpop.eup %1787 }
 0x674   :  { %v434_v1 = vadd.f32 1.0, %v1788_v0 }
 0x676   :  { %1789 = vrcp.f32 %v434_v1 }
 0x680   :  { %v1790_v2 = vpop.eup %1789 }
 0x681   :  { %v438_v7 = vmul.f32 %v1790_v2, %v344_v53 }
 0x6e4   :  { %v441_v4 = vpop.permute.xlu1 %440 }
 0x6e5   :  { %v443_v5 = vmul.f32 %v1790_v2, %v441_v4 }
 0x6e7   :  { %445 = vrot.lane.b32.xlu0 %v443_v5, %s1884_s26  ;;  %v773_v5 = vld [vmem:[#allocation2 + $0x6] sm:$0x1] }
 0x759   :  { %v446_v8 = vpop.permute.xlu0 %445 }
 0x75a   :  { %v448_v9 = vadd.f32 %v446_v8, %v438_v7 }
 0x75c   :  { %1791 = vtanh.f32 %v448_v9 }
 0x766   :  { %v1792_v10 = vpop.eup %1791 }
 0x767   :  { %451 = vrot.lane.b32.xlu1 %v1792_v10, %s1884_s26 }
 0x7d9   :  { %v452_v11 = vpop.permute.xlu1 %451 }
 0x7da   :  { %v454_v14 = vmul.f32 %v1790_v2, %v452_v11 }
 0x7dc   :  { %456 = vrot.lane.b32.xlu0 %v454_v14, %s1885_s2 }
 0x84e   :  { %v457_v15 = vpop.permute.xlu0 %456 }
 0x84f   :  { %459 = vst.msk [vmem:[#allocation3 + $0x2] sm:$0x1] %vm249_vm2, %v457_v15  ;;  %1628 = vmatmul.mubr.msk.f32.vlgmr.msra.gmra.mrb[4].mxu0 %vm57_vm1, %v457_v15 }
 0x850   :  { %460 = vst.msk [vmem:[#allocation3 + $0x5] sm:$0x1] %vm251_vm3, %v457_v15  ;;  %1728 = vmatpush3.bf16.msra.mxu0 %v1994_v12  ;;  %1649 = vmatprep.mubr.msk.f32.mxu0 %vm1882_vm0, %v1883_v6 }
 0x851   :  { %1729 = vmatprep.subr.bf16.mxu0 %v1881_v3 }
 0x854   :  { %1731 = vmatpush3.bf16.msra.mxu0 %v1998_v13 }
 0x855   :  { %1738 = vmatprep.subr.bf16.mxu0 %v1881_v3 }
 0x922   :  { %v530_v17 = vpop.f32.mrb[4].mxu0 }
 0x923   :  { %v534_v18 = vadd.f32 %v530_v17, %v461_v16  ;;  %v1629_v19 = vpop.f32.mrb[5].mxu0 }
 0x925   :  { %1793 = vtanh.f32 %v534_v18  ;;  %v1510_v21 = vmul.f32 -1.442695, %v534_v18 }
 0x927   :  { %1795 = vpow2.f32 %v1510_v21 }
 0x92f   :  { %v1794_v20 = vpop.eup %1793 }
 0x930   :  { %544 = vrot.lane.b32.xlu1 %v1794_v20, %s1884_s26 }
 0x931   :  { %v1796_v22 = vpop.eup %1795 }
 0x932   :  { %v538_v23 = vadd.f32 1.0, %v1796_v22 }
 0x934   :  { %1797 = vrcp.f32 %v538_v23 }
 0x93e   :  { %v1798_v24 = vpop.eup %1797 }
 0x93f   :  { %v542_v27 = vmul.f32 %v1798_v24, %v448_v9 }
 0x9a2   :  { %v545_v25 = vpop.permute.xlu1 %544 }
 0x9a3   :  { %v547_v26 = vmul.f32 %v1798_v24, %v545_v25 }
 0x9a5   :  { %549 = vrot.lane.b32.xlu0 %v547_v26, %s1884_s26  ;;  %v877_v26 = vld [vmem:[#allocation2 + $0x7] sm:$0x1] }
 0xa17   :  { %v550_v28 = vpop.permute.xlu0 %549 }
 0xa18   :  { %v552_v29 = vadd.f32 %v550_v28, %v542_v27 }
 0xa1a   :  { %1799 = vtanh.f32 %v552_v29 }
 0xa24   :  { %v1800_v30 = vpop.eup %1799 }
 0xa25   :  { %555 = vrot.lane.b32.xlu1 %v1800_v30, %s1884_s26 }
 0xa97   :  { %v556_v31 = vpop.permute.xlu1 %555 }
 0xa98   :  { %v558_v32 = vmul.f32 %v1798_v24, %v556_v31 }
 0xa9a   :  { %560 = vrot.lane.b32.xlu0 %v558_v32, %s1885_s2 }
 0xb0c   :  { %v561_v33 = vpop.permute.xlu0 %560 }
 0xb0d   :  { %563 = vst.msk [vmem:[#allocation3 + $0x3] sm:$0x1] %vm249_vm2, %v561_v33  ;;  %1639 = vmatmul.mubr.msk.f32.vlgmr.msra.gmra.mrb[4].mxu1 %vm57_vm1, %v561_v33 }
 0xb0e   :  { %564 = vst.msk [vmem:[#allocation3 + $0x4] sm:$0x1] %vm251_vm3, %v561_v33  ;;  %1734 = vmatpush3.bf16.msra.mxu1 %v1994_v12  ;;  %1660 = vmatprep.mubr.msk.f32.mxu1 %vm1882_vm0, %v1883_v6 }
 0xb0f   :  { %1735 = vmatprep.subr.bf16.mxu1 %v1881_v3 }
 0xb12   :  { %1737 = vmatpush3.bf16.msra.mxu1 %v1998_v13 }
 0xb13   :  { %1744 = vmatprep.subr.bf16.mxu1 %v1881_v3 }
 0xbe0   :  { %v634_v35 = vpop.f32.mrb[4].mxu1 }
 0xbe1   :  { %v638_v36 = vadd.f32 %v634_v35, %v565_v34  ;;  %v1640_v37 = vpop.f32.mrb[5].mxu1 }
 0xbe3   :  { %1801 = vtanh.f32 %v638_v36  ;;  %v1512_v39 = vmul.f32 -1.442695, %v638_v36 }
 0xbe5   :  { %1803 = vpow2.f32 %v1512_v39 }
 0xbed   :  { %v1802_v38 = vpop.eup %1801 }
 0xbee   :  { %648 = vrot.lane.b32.xlu1 %v1802_v38, %s1884_s26 }
 0xbef   :  { %v1804_v40 = vpop.eup %1803 }
 0xbf0   :  { %v642_v41 = vadd.f32 1.0, %v1804_v40  ;;  %v982_v40 = vld [vmem:[%s2339_s6] sm:$0xff] }
 0xbf2   :  { %1805 = vrcp.f32 %v642_v41  ;;  %v983_v41 = vld [vmem:[%s2339_s6 + $0x8] sm:$0xff] }
 0xbfc   :  { %v1806_v42 = vpop.eup %1805 }
 0xbfd   :  { %v646_v45 = vmul.f32 %v1806_v42, %v552_v29 }
 0xc60   :  { %v649_v43 = vpop.permute.xlu1 %648 }
 0xc61   :  { %v651_v44 = vmul.f32 %v1806_v42, %v649_v43  ;;  %v1745_v43 = vpack.c.bf16 %v983_v41, %v982_v40  ;;  %v1889_v41 = vmov 5  }
 0xc63   :  { %653 = vrot.lane.b32.xlu0 %v651_v44, %s1884_s26  ;;  %v985_v44 = vld [vmem:[%s2339_s6 + $0x18] sm:$0xff] }
 0xcd5   :  { %v654_v46 = vpop.permute.xlu0 %653 }
 0xcd6   :  { %v656_v47 = vadd.f32 %v654_v46, %v646_v45 }
 0xcd8   :  { %1807 = vtanh.f32 %v656_v47 }
 0xce2   :  { %v1808_v48 = vpop.eup %1807 }
 0xce3   :  { %659 = vrot.lane.b32.xlu1 %v1808_v48, %s1884_s26 }
 0xd55   :  { %v660_v49 = vpop.permute.xlu1 %659 }
 0xd56   :  { %v662_v50 = vmul.f32 %v1806_v42, %v660_v49  ;;  %v984_v42 = vld [vmem:[%s2339_s6 + $0x10] sm:$0xff] }
 0xd57   :  { %v1748_v45 = vpack.c.bf16 %v985_v44, %v984_v42 }
 0xd58   :  { %664 = vrot.lane.b32.xlu0 %v662_v50, %s1885_s2  ;;  %v1066_v50 = vld [vmem:[%s2341_s8] sm:$0x3f] }
 0xdca   :  { %v665_v51 = vpop.permute.xlu0 %664 }
 0xdcb   :  { %667 = vst.msk [vmem:[#allocation3 + $0x4] sm:$0x1] %vm249_vm2, %v665_v51  ;;  %1650 = vmatmul.mubr.msk.f32.vlgmr.msra.gmra.mrb[6].mxu0 %vm57_vm1, %v665_v51 }
 0xdcc   :  { %668 = vst.msk [vmem:[#allocation3 + $0x3] sm:$0x1] %vm251_vm3, %v665_v51  ;;  %1740 = vmatpush3.bf16.msra.mxu0 %v1994_v12  ;;  %1671 = vmatprep.mubr.msk.f32.mxu0 %vm1882_vm0, %v1883_v6  ;;  %v1886_v51 = vmov 0  }
 0xdcd   :  { %1741 = vmatprep.subr.bf16.mxu0 %v1881_v3  ;;  %1763 = vset.pattern.permute.xlu0 %v1886_v51 }
 0xdd0   :  { %1743 = vmatpush3.bf16.msra.mxu0 %v1998_v13 }
 0xdd1   :  { %1685 = vmatprep.subr.mxu0 %v1883_v6 }
 0xe9e   :  { %v738_v53 = vpop.f32.mrb[6].mxu0 }
 0xe9f   :  { %v742_v54 = vadd.f32 %v738_v53, %v669_v52  ;;  %v1651_v55 = vpop.f32.mrb[7].mxu0  ;;  %v1148_v52 = vlaneseq  ;;  %v1519_v53 = vld [vmem:[%s2340_s7] ss:$0 sm:$0xff] }
 0xea1   :  { %1809 = vtanh.f32 %v742_v54  ;;  %v1514_v57 = vmul.f32 -1.442695, %v742_v54  ;;  %v2146_v54 = vshrl.u32 %v1148_v52, 7 }
 0xea3   :  { %1811 = vpow2.f32 %v1514_v57 }
 0xeab   :  { %v1810_v56 = vpop.eup %1809 }
 0xeac   :  { %752 = vrot.lane.b32.xlu1 %v1810_v56, %s1884_s26 }
 0xead   :  { %v1812_v12 = vpop.eup %1811 }
 0xeae   :  { %v746_v58 = vadd.f32 1.0, %v1812_v12  ;;  %v1146_v12 = vld [vmem:[%s2343_s10] sm:$0x7f]  ;;  %s1891_s10 = smov 121  }
 0xeb0   :  { %1813 = vrcp.f32 %v746_v58 }
 0xeba   :  { %v1814_v59 = vpop.eup %1813 }
 0xebb   :  { %v750_v13 = vmul.f32 %v1814_v59, %v656_v47 }
 0xf1e   :  { %v753_v60 = vpop.permute.xlu1 %752 }
 0xf1f   :  { %v755_v61 = vmul.f32 %v1814_v59, %v753_v60 }
 0xf21   :  { %757 = vrot.lane.b32.xlu0 %v755_v61, %s1884_s26 }
 0xf93   :  { %v758_v62 = vpop.permute.xlu0 %757 }
 0xf94   :  { %v760_v63 = vadd.f32 %v758_v62, %v750_v13  ;;  %v2158_v62 = vld [vmem:[%s2344_s11] sm:$0x7f]  ;;  %s1892_s11 = smov [#allocation4]  }
 0xf95   :  { %s1478_s24 = sshll.u32 %s1892_s11, 4  ;;  %s1479_s24 = int_to_ptr.vmem [resolvable:$true] %s1478_s24 }
 0xf96   :  { %1815 = vtanh.f32 %v760_v63  ;;  %s1833_s3 = scalar_lea.vmem %s1479_s24, 16  ;;  %s1837_s25 = scalar_lea.vmem %s1479_s24, 32 }
 0xf97   :  { %p1834_p0 = scmp.ne.s32.totalorder %s1479_s24, %s1833_s3  ;;  %p1838_p1 = scmp.lt.s32.totalorder %s1479_s24, %s1479_s24 }
 0xf98   :  { %p1839_p2 = scmp.lt.s32.totalorder %s1837_s25, %s1833_s3 }
 0xf9a   :  { %p1840_p3 = por %p1839_p2, %p1838_p1 }
 0xf9c   :  { %p1841_p4 = pnand %p1840_p3, %p1834_p0 }
 0xfa0   :  { %v1816_v0 = vpop.eup %1815 }
 0xfa1   :  { %763 = vrot.lane.b32.xlu1 %v1816_v0, %s1884_s26 }
0x1013   :  { %v764_v1 = vpop.permute.xlu1 %763 }
0x1014   :  { %v766_v2 = vmul.f32 %v1814_v59, %v764_v1  ;;  %v1158_v59 = vsub.s32 6, %v2146_v54 }
0x1016   :  { %768 = vrot.lane.b32.xlu0 %v766_v2, %s1885_s2  ;;  %v1887_v2 = vmov 1  }
0x1088   :  { %v769_v4 = vpop.permute.xlu0 %768 }
0x1089   :  { %771 = vst.msk [vmem:[#allocation3 + $0x5] sm:$0x1] %vm249_vm2, %v769_v4  ;;  %1661 = vmatmul.mubr.msk.f32.vlgmr.msra.gmra.mrb[6].mxu1 %vm57_vm1, %v769_v4 }
0x108a   :  { %772 = vst.msk [vmem:[#allocation3 + $0x2] sm:$0x1] %vm251_vm3, %v769_v4  ;;  %1682 = vmatprep.mubr.msk.f32.mxu1 %vm1882_vm0, %v1883_v6  ;;  %1746 = vmatpush3.bf16.msra.mxu1 %v1745_v43 }
0x108b   :  { %1747 = vmatprep.subr.bf16.mxu1 %v1881_v3  ;;  %v1067_v3 = vld [vmem:[%s2342_s9] sm:$0x3f] }
0x108e   :  { %1749 = vmatpush3.bf16.msra.mxu1 %v1748_v45 }
0x115c   :  { %v842_v7 = vpop.f32.mrb[6].mxu1 }
0x115d   :  { %v846_v8 = vadd.f32 %v842_v7, %v773_v5  ;;  %v1662_v9 = vpop.f32.mrb[7].mxu1 }
0x115f   :  { %1817 = vtanh.f32 %v846_v8  ;;  %v1516_v11 = vmul.f32 -1.442695, %v846_v8 }
0x1161   :  { %1819 = vpow2.f32 %v1516_v11 }
0x1169   :  { %v1818_v10 = vpop.eup %1817 }
0x116a   :  { %856 = vrot.lane.b32.xlu1 %v1818_v10, %s1884_s26 }
0x116b   :  { %v1820_v14 = vpop.eup %1819 }
0x116c   :  { %v850_v15 = vadd.f32 1.0, %v1820_v14 }
0x116e   :  { %1821 = vrcp.f32 %v850_v15 }
0x1178   :  { %v1822_v16 = vpop.eup %1821 }
0x1179   :  { %v854_v19 = vmul.f32 %v1822_v16, %v760_v63 }
0x11dc   :  { %v857_v17 = vpop.permute.xlu1 %856 }
0x11dd   :  { %v859_v18 = vmul.f32 %v1822_v16, %v857_v17 }
0x11df   :  { %861 = vrot.lane.b32.xlu0 %v859_v18, %s1884_s26 }
0x1251   :  { %v862_v20 = vpop.permute.xlu0 %861 }
0x1252   :  { %v864_v21 = vadd.f32 %v862_v20, %v854_v19  ;;  %v1211_v20 = vsub.s32 2, %v2146_v54 }
0x1254   :  { %1823 = vtanh.f32 %v864_v21 }
0x125e   :  { %v1824_v22 = vpop.eup %1823 }
0x125f   :  { %867 = vrot.lane.b32.xlu1 %v1824_v22, %s1884_s26 }
0x12d1   :  { %v868_v23 = vpop.permute.xlu1 %867 }
0x12d2   :  { %v870_v24 = vmul.f32 %v1822_v16, %v868_v23 }
0x12d4   :  { %872 = vrot.lane.b32.xlu0 %v870_v24, %s1885_s2 }
0x1346   :  { %v873_v25 = vpop.permute.xlu0 %872 }
0x1347   :  { %875 = vst.msk [vmem:[#allocation3 + $0x6] sm:$0x1] %vm249_vm2, %v873_v25  ;;  %1672 = vmatmul.mubr.msk.f32.vlgmr.msra.gmra.mrb[8].mxu0 %vm57_vm1, %v873_v25 }
0x1348   :  { %876 = vst.msk [vmem:[#allocation3 + $0x1] sm:$0x1] %vm251_vm3, %v873_v25  ;;  %1687 = vmatprep.mubr.msk.f32.mxu0 %vm1882_vm0, %v1883_v6  ;;  %v1888_v25 = vmov 3  }
0x1349   :  { %1765 = vset.pattern.permute.xlu1 %v1888_v25 }
0x141a   :  { %v946_v27 = vpop.f32.mrb[8].mxu0 }
0x141b   :  { %v950_v28 = vadd.f32 %v946_v27, %v877_v26  ;;  %v1673_v29 = vpop.f32.mrb[9].mxu0 }
0x141d   :  { %1825 = vtanh.f32 %v950_v28  ;;  %v1518_v31 = vmul.f32 -1.442695, %v950_v28 }
0x141f   :  { %1827 = vpow2.f32 %v1518_v31 }
0x1427   :  { %v1826_v30 = vpop.eup %1825 }
0x1428   :  { %960 = vrot.lane.b32.xlu1 %v1826_v30, %s1884_s26 }
0x1429   :  { %v1828_v32 = vpop.eup %1827 }
0x142a   :  { %v954_v33 = vadd.f32 1.0, %v1828_v32 }
0x142c   :  { %1829 = vrcp.f32 %v954_v33 }
0x1436   :  { %v1830_v34 = vpop.eup %1829 }
0x1437   :  { %v958_v37 = vmul.f32 %v1830_v34, %v864_v21 }
0x149a   :  { %v961_v35 = vpop.permute.xlu1 %960 }
0x149b   :  { %v963_v36 = vmul.f32 %v1830_v34, %v961_v35 }
0x149d   :  { %965 = vrot.lane.b32.xlu0 %v963_v36, %s1884_s26 }
0x150f   :  { %v966_v6 = vpop.permute.xlu0 %965 }
0x1510   :  { %v968_v38 = vadd.f32 %v966_v6, %v958_v37  ;;  %v1263_v37 = vsub.s32 4, %v2146_v54 }
0x1512   :  { %1831 = vtanh.f32 %v968_v38 }
0x151c   :  { %v1832_v39 = vpop.eup %1831 }
0x151d   :  { %971 = vrot.lane.b32.xlu1 %v1832_v39, %s1884_s26 }
0x158f   :  { %v972_v46 = vpop.permute.xlu1 %971 }
0x1590   :  { %v974_v47 = vmul.f32 %v1830_v34, %v972_v46 }
0x1592   :  { %976 = vrot.lane.b32.xlu0 %v974_v47, %s1885_s2 }
0x1596   :  { %1070 = vperm.xlu0 %1763, %v1067_v3  }
0x159a   :  { %1764 = vset.pattern.permute.xlu0 %v1887_v2 }
0x1604   :  { %v977_v48 = vpop.permute.xlu0 %976 }
0x1605   :  { %979 = vst.msk [vmem:[#allocation3 + $0x7] sm:$0x1] %vm249_vm2, %v977_v48 }
0x1606   :  { %980 = vst.msk [vmem:[#allocation3] sm:$0x1] %vm251_vm3, %v977_v48 }
0x160d   :  { %v981_v49 = vld [vmem:[#allocation3] sm:$0xff] }
0x160e   :  { %1683 = vmatmul.mubr.msk.f32.vlgmr.msra.gmra.mrb[8].mxu1 %vm57_vm1, %v981_v49  ;;  %1686 = vmatpush3.xpose.msk.msra.mxu0 %vm57_vm1, %v981_v49 }
0x1611   :  { %1688 = vmatmul.mubr.msk.f32.vlgmr.msra.gmra.mrb[10].mxu0 %vm57_vm1, %v1066_v50 }
0x1615   :  { %v1071_v4 = vpop.permute.xlu0 %1070 }
0x16e1   :  { %v1062_v55 = vpop.f32.mrb[8].mxu1 }
0x16e2   :  { %v2148_v56 = vadd.f32 %v1519_v53, %v1062_v55  ;;  %v1684_v57 = vpop.f32.mrb[9].mxu1 }
0x16e4   :  { %v1153_v58 = vrot.slane %v2148_v56, 2  ;;  %v1142_v60 = vpop.f32.mrb[10].mxu0 }
0x16e5   :  { %v1689_v61 = vpop.f32.mrb[11].mxu0  ;;  %v2167_v5 = vadd.f32 %v1142_v60, %v1071_v4 }
0x16e6   :  { %v1155_v13 = vadd.f32 %v1153_v58, %v1146_v12  ;;  %v2222_v58 = vand.u32 127, %v1148_v52 }
0x16e8   :  { %v1159_v63 = vrot.slane %v1155_v13, %v1158_v59 }
0x16ea   :  { %v2163_v0 = vadd.f32 %v1159_v63, %v2158_v62 }
0x16ec   :  { %v1162_v1 = vsel %vm1161_vm4, %v2163_v0, -inf }
0x16ed   :  { %1163 = vmax.xlane.f32.xlu1 %v1162_v1 }
0x177a   :  { %v2169_v7 = vpop.xlane.xlu1 %1163 }
0x177b   :  { %v1182_v8 = vadd.f32 %v2169_v7, %v2167_v5 }
0x177d   :  { %1185 = vperm.xlu0 %1764, %v1182_v8  }
0x17fc   :  { %v1186_v9 = vpop.permute.xlu0 %1185 }
0x17fd   :  { %v2173_v10 = vadd.f32 %v1186_v9, %v1146_v12 }
0x17ff   :  { %v1189_v11 = vsel %vm1161_vm4, %v2173_v10, -inf }
0x1800   :  { %v1190_v14 = vrot.slane %v1189_v11, 4 }
0x1802   :  { %v1191_v15 = vmax.f32 %v1189_v11, %v1190_v14  ;;  %v1890_v11 = vmov 7  }
0x1803   :  { %1767 = vset.pattern.permute.xlu0 %v1890_v11 }
0x1804   :  { %v1192_v16 = vrot.slane %v1191_v15, 2 }
0x1806   :  { %v1193_v17 = vmax.f32 %v1191_v15, %v1192_v16 }
0x1808   :  { %v1194_v18 = vrot.slane %v1193_v17, 1 }
0x180a   :  { %v2177_v19 = vmax.f32 %v1193_v17, %v1194_v18 }
0x180c   :  { %vm1196_vm5 = vcmp.eq.f32.partialorder %v2173_v10, %v2177_v19  ;;  %v1208_v21 = vadd.f32 %v2177_v19, %v2148_v56 }
0x180e   :  { %v1212_v22 = vrot.slane %v1208_v21, %v1211_v20 }
0x1810   :  { %v2185_v23 = vadd.f32 %v1212_v22, %v2158_v62 }
0x1812   :  { %v1214_v24 = vsel %vm1161_vm4, %v2185_v23, -inf }
0x1813   :  { %1215 = vmax.xlane.f32.xlu0 %v1214_v24 }
0x18a0   :  { %v2189_v26 = vpop.xlane.xlu0 %1215 }
0x18a1   :  { %v1234_v27 = vadd.f32 %v2189_v26, %v2167_v5  ;;  %vm1217_vm1 = vcmp.eq.f32.partialorder %v2185_v23, %v2189_v26 }
0x18a3   :  { %1237 = vperm.xlu1 %1765, %v1234_v27  }
0x18a7   :  { %1766 = vset.pattern.permute.xlu1 %v1889_v41 }
0x1922   :  { %v1238_v28 = vpop.permute.xlu1 %1237 }
0x1923   :  { %v2193_v29 = vadd.f32 %v1238_v28, %v1146_v12 }
0x1925   :  { %v1241_v30 = vsel %vm1161_vm4, %v2193_v29, -inf }
0x1926   :  { %v1242_v31 = vrot.slane %v1241_v30, 4 }
0x1928   :  { %v1243_v32 = vmax.f32 %v1241_v30, %v1242_v31 }
0x192a   :  { %v1244_v33 = vrot.slane %v1243_v32, 2 }
0x192c   :  { %v1245_v34 = vmax.f32 %v1243_v32, %v1244_v33 }
0x192e   :  { %v1246_v35 = vrot.slane %v1245_v34, 1 }
0x1930   :  { %v2197_v36 = vmax.f32 %v1245_v34, %v1246_v35 }
0x1932   :  { %vm1248_vm6 = vcmp.eq.f32.partialorder %v2193_v29, %v2197_v36  ;;  %v1260_v6 = vadd.f32 %v2197_v36, %v2148_v56 }
0x1934   :  { %v1264_v38 = vrot.slane %v1260_v6, %v1263_v37 }
0x1936   :  { %v1265_v39 = vadd.f32 %v1264_v38, %v2158_v62 }
0x1938   :  { %v1266_v40 = vsel %vm1161_vm4, %v1265_v39, -inf }
0x1939   :  { %1267 = vmax.xlane.f32.xlu0 %v1266_v40 }
0x19c6   :  { %v1268_v42 = vpop.xlane.xlu0 %1267 }
0x19c7   :  { %v1286_v43 = vadd.f32 %v1268_v42, %v2167_v5  ;;  %vm1269_vm8 = vcmp.eq.f32.partialorder %v1265_v39, %v1268_v42 }
0x19c8   :  { %v1270_v60 = vsel %vm1269_vm8, %v2222_v58, 6 }
0x19c9   :  { %1289 = vperm.xlu1 %1766, %v1286_v43   ;;  %v2228_v63 = vsel %vm1161_vm4, %v1270_v60, 2147483647 }
0x19ca   :  { %v1273_v1 = vshra.s32 %v2228_v63, 16 }
0x19cc   :  { %v2231_v2 = vcvt.s32.f32 %v1273_v1  ;;  %v1272_v1 = vand.u32 65535, %v2228_v63  ;;  %v1249_v63 = vsel %vm1248_vm6, %v2146_v54, 6 }
0x19cd   :  { %1768 = vset.pattern.permute.xlu1 %v1890_v11 }
0x1a48   :  { %v1290_v44 = vpop.permute.xlu1 %1289 }
0x1a49   :  { %v2207_v45 = vadd.f32 %v1290_v44, %v1146_v12 }
0x1a4b   :  { %v1293_v46 = vsel %vm1161_vm4, %v2207_v45, -inf }
0x1a4c   :  { %v1294_v47 = vrot.slane %v1293_v46, 4 }
0x1a4e   :  { %v1295_v48 = vmax.f32 %v1293_v46, %v1294_v47  ;;  %v1218_v47 = vsel %vm1217_vm1, %v2222_v58, 6 }
0x1a50   :  { %v1296_v49 = vrot.slane %v1295_v48, 2 }
0x1a52   :  { %v1297_v50 = vmax.f32 %v1295_v48, %v1296_v49  ;;  %v1219_v48 = vsel %vm1161_vm4, %v1218_v47, 2147483647 }
0x1a53   :  { %v1221_v49 = vshra.s32 %v1219_v48, 16 }
0x1a54   :  { %v1298_v3 = vrot.slane %v1297_v50, 1 }
0x1a56   :  { %v2211_v51 = vmax.f32 %v1297_v50, %v1298_v3  ;;  %v1223_v50 = vcvt.s32.f32 %v1221_v49 }
0x1a58   :  { %vm1300_vm7 = vcmp.eq.f32.partialorder %v2207_v45, %v2211_v51  ;;  %v1312_v53 = vadd.f32 %v2211_v51, %v2148_v56 }
0x1a59   :  { %v1301_v3 = vsel %vm1300_vm7, %v2146_v54, 6 }
0x1a5a   :  { %v1316_v55 = vrot.slane %v1312_v53, %v1158_v59  ;;  %v1302_v53 = vsel %vm1161_vm4, %v1301_v3, 2147483647 }
0x1a5c   :  { %v1317_v57 = vadd.f32 %v1316_v55, %v2158_v62  ;;  %v1303_v55 = vrot.slane %v1302_v53, 4 }
0x1a5e   :  { %v1318_v12 = vsel %vm1161_vm4, %v1317_v57, -inf  ;;  %vm1304_vm2 = vcmp.lt.s32.totalorder %v1302_v53, %v1303_v55 }
0x1a5f   :  { %1319 = vmax.xlane.f32.xlu0 %v1318_v12 }
0x1aec   :  { %v1320_v61 = vpop.xlane.xlu0 %1319 }
0x1aed   :  { %vm1321_vm9 = vcmp.eq.f32.partialorder %v1317_v57, %v1320_v61  ;;  %v1338_v14 = vadd.f32 %v1320_v61, %v2167_v5  ;;  %v1305_v57 = vsel %vm1304_vm2, %v1302_v53, %v1303_v55  ;;  %vm1165_vm2 = vcmp.eq.f32.partialorder %v2163_v0, %v2169_v7 }
0x1aee   :  { %v1322_v13 = vsel %vm1321_vm9, %v2222_v58, 6  ;;  %v1306_v23 = vrot.slane %v1305_v57, 2  ;;  %vm1386_vm9 = vcmask 48128  }
0x1aef   :  { %v1323_v56 = vsel %vm1161_vm4, %v1322_v13, 2147483647  ;;  %v1340_v15 = vsel %vm1339_vm11, %v1338_v14, -inf }
0x1af0   :  { %v1325_v59 = vshra.s32 %v1323_v56, 16  ;;  %v1324_v52 = vand.u32 65535, %v1323_v56  ;;  %v1341_v16 = vrot.slane %v1340_v15, 4  ;;  %vm1307_vm3 = vcmp.lt.s32.totalorder %v1305_v57, %v1306_v23 }
0x1af1   :  { %v1308_v26 = vsel %vm1307_vm3, %v1305_v57, %v1306_v23  ;;  %v1197_v23 = vsel %vm1196_vm5, %v2146_v54, 6 }
0x1af2   :  { %v1327_v62 = vcvt.s32.f32 %v1325_v59  ;;  %v1326_v8 = vcvt.s32.f32 %v1324_v52  ;;  %v1342_v17 = vmax.f32 %v1340_v15, %v1341_v16  ;;  %v1309_v12 = vrot.slane %v1308_v26, 1 }
0x1af3   :  { %v1198_v0 = vsel %vm1161_vm4, %v1197_v23, 2147483647 }
0x1af4   :  { %1328 = vmin.xlane.f32.xlu1 %v1327_v62  ;;  %v1343_v18 = vrot.slane %v1342_v17, 2  ;;  %vm1310_vm8 = vcmp.lt.s32.totalorder %v1308_v26, %v1309_v12  ;;  %v1199_v7 = vrot.slane %v1198_v0, 4 }
0x1af5   :  { %v1311_v61 = vsel %vm1310_vm8, %v1308_v26, %v1309_v12 }
0x1af6   :  { %v1344_v20 = vmax.f32 %v1342_v17, %v1343_v18  ;;  %vm1200_vm3 = vcmp.lt.s32.totalorder %v1198_v0, %v1199_v7 }
0x1af8   :  { %1276 = vmin.xlane.f32.xlu1 %v2231_v2  ;;  %v1345_v21 = vrot.slane %v1344_v20, 1 }
0x1afa   :  { %v1346_v22 = vmax.f32 %v1344_v20, %v1345_v21 }
0x1afc   :  { %vm1347_vm12 = vcmp.eq.f32.partialorder %v1338_v14, %v1346_v22 }
0x1afd   :  { %v1348_v24 = vsel %vm1347_vm12, %v2146_v54, 6  ;;  %vm1363_vm12 = vcmask 0  }
0x1afe   :  { %v1349_v25 = vsel %vm1339_vm11, %v1348_v24, 2147483647 }
0x1aff   :  { %v1350_v27 = vrot.slane %v1349_v25, 4 }
0x1b01   :  { %vm1351_vm13 = vcmp.lt.s32.totalorder %v1349_v25, %v1350_v27 }
0x1b02   :  { %v1352_v28 = vsel %vm1351_vm13, %v1349_v25, %v1350_v27 }
0x1b03   :  { %v1353_v30 = vrot.slane %v1352_v28, 2 }
0x1b05   :  { %vm1354_vm14 = vcmp.lt.s32.totalorder %v1352_v28, %v1353_v30 }
0x1b06   :  { %v1355_v5 = vsel %vm1354_vm14, %v1352_v28, %v1353_v30  ;;  %vm1404_vm14 = vcmask 1045504  }
0x1b07   :  { %v1356_v31 = vrot.slane %v1355_v5, 1 }
0x1b09   :  { %vm1357_vm15 = vcmp.lt.s32.totalorder %v1355_v5, %v1356_v31 }
0x1b0a   :  { %v2238_v35 = vsel %vm1357_vm15, %v1355_v5, %v1356_v31 }
0x1b0b   :  { %vm1370_vm0 = vcmp.eq.s32.totalorder %v2146_v54, %v2238_v35 }
0x1b81   :  { %v1329_v4 = vpop.xlane.xlu1 %1328 }
0x1b82   :  { %vm1330_vm10 = vcmp.eq.f32.partialorder %v1327_v62, %v1329_v4  ;;  %v1335_v32 = vcvt.f32.s32 %v1329_v4  ;;  %v1274_v4 = vcvt.s32.f32 %v1272_v1 }
0x1b83   :  { %v1331_v9 = vsel %vm1330_vm10, %v1326_v8, inf }
0x1b84   :  { %1332 = vmin.xlane.f32.xlu0 %v1331_v9  ;;  %v1336_v34 = vshll.u32 %v1335_v32, 16  ;;  %v1220_v9 = vand.u32 65535, %v1219_v48 }
0x1b85   :  { %v1277_v62 = vpop.xlane.xlu1 %1276 }
0x1b86   :  { %vm1278_vm7 = vcmp.eq.f32.partialorder %v2231_v2, %v1277_v62  ;;  %v1222_v14 = vcvt.s32.f32 %v1220_v9  ;;  %v1250_v2 = vsel %vm1161_vm4, %v1249_v63, 2147483647 }
0x1b87   :  { %v1279_v8 = vsel %vm1278_vm7, %v1274_v4, inf  ;;  %v1251_v17 = vrot.slane %v1250_v2, 4 }
0x1b89   :  { %vm1252_vm13 = vcmp.lt.s32.totalorder %v1250_v2, %v1251_v17 }
0x1b8a   :  { %v1253_v27 = vsel %vm1252_vm13, %v1250_v2, %v1251_v17 }
0x1b8b   :  { %v1254_v32 = vrot.slane %v1253_v27, 2 }
0x1b8d   :  { %vm1255_vm15 = vcmp.lt.s32.totalorder %v1253_v27, %v1254_v32 }
0x1c11   :  { %v1333_v33 = vpop.xlane.xlu0 %1332 }
0x1c12   :  { %v1334_v37 = vcvt.f32.s32 %v1333_v33 }
0x1c14   :  { %v1337_v6 = vadd.s32 %v1336_v34, %v1334_v37 }
0x1c16   :  { %v1371_v38 = vsel %vm1370_vm0, %v1337_v6, 0  ;;  %v1256_v6 = vsel %vm1255_vm15, %v1253_v27, %v1254_v32 }
0x1c17   :  { %v1372_v39 = vsel %vm1339_vm11, %v1371_v38, 0 }
0x1c18   :  { %v1373_v40 = vrot.slane %v1372_v39, 4 }
0x1c1a   :  { %v1374_v41 = vadd.s32 %v1373_v40, %v1372_v39  ;;  %v1257_v39 = vrot.slane %v1256_v6, 1 }
0x1c1c   :  { %v1375_v42 = vrot.slane %v1374_v41, 2  ;;  %vm1258_vm0 = vcmp.lt.s32.totalorder %v1256_v6, %v1257_v39 }
0x1c1e   :  { %v1376_v43 = vadd.s32 %v1375_v42, %v1374_v41 }
0x1c20   :  { %v1377_v44 = vrot.slane %v1376_v43, 1 }
0x1c22   :  { %v1378_v46 = vadd.s32 %v1377_v44, %v1376_v43  ;;  %v1259_v43 = vsel %vm1258_vm0, %v1256_v6, %v1257_v39 }
0x1c24   :  { %1381 = vperm.xlu0 %1767, %v1378_v46  }
0x1c43   :  { %1224 = vmin.xlane.f32.xlu0 %v1223_v50 }
0x1c59   :  { %1360 = vrot.lane.b32.xlu0 %v1346_v22, %s1891_s10  ;;  %v1283_v22 = vcvt.f32.s32 %v1277_v62 }
0x1c5b   :  { %v1284_v5 = vshll.u32 %v1283_v22, 16 }
0x1ca3   :  { %v2252_v60 = vpop.permute.xlu0 %1381 }
0x1ca4   :  { %vm1384_vm10 = vcmp.eq.s32.totalorder %v2222_v58, %v2252_v60 }
0x1ca5   :  { %v1385_v13 = vsel %vm1384_vm10, %v1311_v61, 0 }
0x1ca6   :  { %v1387_v45 = vsel %vm1386_vm9, %v1385_v13, 0 }
0x1ca7   :  { %v1389_v51 = vshrl.u32 %v1387_v45, 16  ;;  %v1388_v59 = vand.u32 65535, %v1387_v45 }
0x1ca9   :  { %v1391_v56 = vcvt.s32.f32 %v1389_v51  ;;  %v1390_v52 = vcvt.s32.f32 %v1388_v59 }
0x1cab   :  { %1394 = vadd.xlane.f32.xlu1 %v1391_v56  ;;  %v1201_v56 = vsel %vm1200_vm3, %v1198_v0, %v1199_v7 }
0x1cac   :  { %v1202_v10 = vrot.slane %v1201_v56, 2 }
0x1cae   :  { %vm1203_vm8 = vcmp.lt.s32.totalorder %v1201_v56, %v1202_v10 }
0x1caf   :  { %1392 = vadd.xlane.f32.xlu1 %v1390_v52  ;;  %v1204_v2 = vsel %vm1203_vm8, %v1201_v56, %v1202_v10 }
0x1cb3   :  { %1280 = vmin.xlane.f32.xlu1 %v1279_v8 }
0x1cd0   :  { %v2259_v11 = vpop.xlane.xlu0 %1224 }
0x1cd1   :  { %vm1226_vm11 = vcmp.eq.f32.partialorder %v1223_v50, %v2259_v11  ;;  %v1166_v50 = vsel %vm1165_vm2, %v2222_v58, 6  ;;  %v1231_v13 = vcvt.f32.s32 %v2259_v11 }
0x1cd2   :  { %v1227_v15 = vsel %vm1226_vm11, %v1222_v14, inf  ;;  %v1167_v53 = vsel %vm1161_vm4, %v1166_v50, 2147483647 }
0x1cd3   :  { %v1169_v55 = vshra.s32 %v1167_v53, 16  ;;  %v1168_v1 = vand.u32 65535, %v1167_v53  ;;  %v1232_v52 = vshll.u32 %v1231_v13, 16 }
0x1cd4   :  { %v1361_v16 = vpop.permute.xlu0 %1360 }
0x1cd5   :  { %1364 = vst.msk [vmem:[#allocation4] sm:$0x1] %vm1363_vm12, %v1361_v16  ;;  %v1171_v57 = vcvt.s32.f32 %v1169_v55  ;;  %v1170_v9 = vcvt.s32.f32 %v1168_v1 }
0x1d38   :  { %v1395_v18 = vpop.xlane.xlu1 %1394 }
0x1d39   :  { %v1397_v20 = vcvt.f32.s32 %v1395_v18  ;;  %v1205_v18 = vrot.slane %v1204_v2, 1 }
0x1d3b   :  { %v1398_v25 = vshll.u32 %v1397_v20, 16  ;;  %vm1206_vm10 = vcmp.lt.s32.totalorder %v1204_v2, %v1205_v18 }
0x1d3c   :  { %v1393_v21 = vpop.xlane.xlu1 %1392 }
0x1d3d   :  { %v1396_v24 = vcvt.f32.s32 %v1393_v21 }
0x1d3f   :  { %v2267_v28 = vadd.s32 %v1398_v25, %v1396_v24  ;;  %v1207_v24 = vsel %vm1206_vm10, %v1204_v2, %v1205_v18 }
0x1d40   :  { %v1281_v30 = vpop.xlane.xlu1 %1280 }
0x1d41   :  { %v1282_v31 = vcvt.f32.s32 %v1281_v30  ;;  %vm1402_vm6 = vcmp.eq.s32.totalorder %v2146_v54, %v2267_v28 }
0x1d43   :  { %v1285_v29 = vadd.s32 %v1284_v5, %v1282_v31 }
0x1d45   :  { %v1403_v36 = vsel %vm1402_vm6, %v1285_v29, 0 }
0x1d46   :  { %v1405_v33 = vsel %vm1404_vm14, %v1403_v36, 0 }
0x1d47   :  { %v1406_v34 = vrot.slane %v1405_v33, 4 }
0x1d49   :  { %v1407_v37 = vadd.s32 %v1406_v34, %v1405_v33 }
0x1d4b   :  { %v1408_v38 = vrot.slane %v1407_v37, 2 }
0x1d4d   :  { %v1409_v40 = vadd.s32 %v1408_v38, %v1407_v37 }
0x1d4f   :  { %v1410_v41 = vrot.slane %v1409_v40, 1 }
0x1d51   :  { %v2272_v42 = vadd.s32 %v1410_v41, %v1409_v40 }
0x1d53   :  { %vm1414_vm1 = vcmp.eq.s32.totalorder %v2222_v58, %v2272_v42 }
0x1d54   :  { %v1415_v44 = vsel %vm1414_vm1, %v1259_v43, 0 }
0x1d55   :  { %v1416_v46 = vsel %vm1386_vm9, %v1415_v44, 0 }
0x1d56   :  { %v1418_v47 = vshrl.u32 %v1416_v46, 16  ;;  %v1417_v49 = vand.u32 65535, %v1416_v46 }
0x1d58   :  { %v1420_v48 = vcvt.s32.f32 %v1418_v47  ;;  %v1419_v3 = vcvt.s32.f32 %v1417_v49 }
0x1d5a   :  { %1423 = vadd.xlane.f32.xlu1 %v1420_v48 }
0x1d5e   :  { %1421 = vadd.xlane.f32.xlu1 %v1419_v3 }
0x1d62   :  { %1228 = vmin.xlane.f32.xlu1 %v1227_v15 }
0x1d66   :  { %1172 = vmin.xlane.f32.xlu1 %v1171_v57 }
0x1de7   :  { %v1424_v26 = vpop.xlane.xlu1 %1423 }
0x1de8   :  { %v1426_v12 = vcvt.f32.s32 %v1424_v26 }
0x1dea   :  { %v1427_v51 = vshll.u32 %v1426_v12, 16 }
0x1deb   :  { %v1422_v61 = vpop.xlane.xlu1 %1421 }
0x1dec   :  { %v1425_v45 = vcvt.f32.s32 %v1422_v61 }
0x1dee   :  { %v2287_v59 = vadd.s32 %v1427_v51, %v1425_v45 }
0x1def   :  { %v1229_v62 = vpop.xlane.xlu1 %1228 }
0x1df0   :  { %v1230_v4 = vcvt.f32.s32 %v1229_v62  ;;  %vm1431_vm4 = vcmp.eq.s32.totalorder %v2146_v54, %v2287_v59 }
0x1df2   :  { %v1233_v19 = vadd.s32 %v1232_v52, %v1230_v4 }
0x1df3   :  { %v1173_v8 = vpop.xlane.xlu1 %1172 }
0x1df4   :  { %v1432_v14 = vsel %vm1431_vm4, %v1233_v19, 0  ;;  %vm1174_vm5 = vcmp.eq.f32.partialorder %v1171_v57, %v1173_v8 }
0x1df5   :  { %v1433_v11 = vsel %vm1404_vm14, %v1432_v14, 0  ;;  %v1175_v15 = vsel %vm1174_vm5, %v1170_v9, inf }
0x1df6   :  { %v1434_v16 = vrot.slane %v1433_v11, 4  ;;  %1176 = vmin.xlane.f32.xlu1 %v1175_v15 }
0x1df8   :  { %v1435_v63 = vadd.s32 %v1434_v16, %v1433_v11 }
0x1dfa   :  { %v1436_v17 = vrot.slane %v1435_v63, 2 }
0x1dfc   :  { %v1437_v20 = vadd.s32 %v1436_v17, %v1435_v63 }
0x1dfe   :  { %v1438_v21 = vrot.slane %v1437_v20, 1 }
0x1e00   :  { %v1439_v22 = vadd.s32 %v1438_v21, %v1437_v20 }
0x1e02   :  { %vm1442_vm7 = vcmp.eq.s32.totalorder %v2222_v58, %v1439_v22 }
0x1e03   :  { %v1443_v25 = vsel %vm1442_vm7, %v1207_v24, 0 }
0x1e04   :  { %v1444_v27 = vsel %vm1386_vm9, %v1443_v25, 0 }
0x1e05   :  { %v1446_v30 = vshrl.u32 %v1444_v27, 16  ;;  %v1445_v31 = vand.u32 65535, %v1444_v27 }
0x1e07   :  { %v1448_v5 = vcvt.s32.f32 %v1446_v30  ;;  %v1447_v32 = vcvt.s32.f32 %v1445_v31 }
0x1e09   :  { %1451 = vadd.xlane.f32.xlu1 %v1448_v5 }
0x1e0d   :  { %1449 = vadd.xlane.f32.xlu1 %v1447_v32 }
0x1e1e   :  { %1367 = vperm.xlu1 %1768, %v2238_v35  }
0x1e1f   :  { %1844 = shalt.err (!%p1841_p4)
}
0x1e20   :  { %s1845_s26 = scalar_lea.hbm %s2345_s12, 16 }
0x1e21   :  { %p1846_p5 = scmp.ne.s32.totalorder %s2345_s12, %s1845_s26  ;;  %p1849_p6 = scmp.lt.u32.totalorder %s1845_s26, %s2345_s12 }
0x1e23   :  { %p1851_p7 = pnand %p1849_p6, %p1846_p5 }
0x1e25   :  { %1854 = shalt.err (!%p1851_p7)
}
0x1e26   :  { %1481 = dma.vmem_to_hbm [thread:$0]  %s1479_s24, 16, %s2345_s12, [#allocation5]   ;;  %v1179_v33 = vcvt.f32.s32 %v1173_v8  ;;  %vm1365_vm9 = vcmp.eq.s32.totalorder %v2222_v58, 7  ;;  %vm1379_vm11 = vcmp.eq.s32.totalorder %v2222_v58, 6  ;;  %vm1400_vm12 = vcmp.eq.s32.totalorder %v2222_v58, 5 }
0x1e27   :  { %vm1412_vm6 = vcmp.eq.s32.totalorder %v2222_v58, 4  ;;  %vm1429_vm15 = vcmp.eq.s32.totalorder %v2222_v58, 3  ;;  %vm1440_vm0 = vcmp.eq.s32.totalorder %v2222_v58, 2  ;;  %vm1457_vm1 = vcmp.eq.s32.totalorder %v2222_v58, 1  ;;  %s1893_s12 = smov [#allocation6]  }
0x1e28   :  { %v1180_v39 = vshll.u32 %v1179_v33, 16  ;;  %s1488_s14 = sshll.u32 %s1893_s12, 4  ;;  %vm1470_vm2 = vcmask 57344   ;;  %s1489_s14 = int_to_ptr.vmem [resolvable:$true] %s1488_s14 }
0x1e29   :  { %s1855_s15 = scalar_lea.vmem %s1489_s14, 16  ;;  %s1859_s16 = scalar_lea.vmem %s1489_s14, 32 }
0x1e2a   :  { %p1856_p8 = scmp.ne.s32.totalorder %s1489_s14, %s1855_s15  ;;  %p1860_p9 = scmp.lt.s32.totalorder %s1489_s14, %s1489_s14 }
0x1e2b   :  { %p1861_p10 = scmp.lt.s32.totalorder %s1859_s16, %s1855_s15 }
0x1e2d   :  { %p1862_p11 = por %p1861_p10, %p1860_p9 }
0x1e2f   :  { %p1863_p12 = pnand %p1862_p11, %p1856_p8 }
0x1e83   :  { %v1177_v35 = vpop.xlane.xlu1 %1176 }
0x1e84   :  { %v1178_v34 = vcvt.f32.s32 %v1177_v35 }
0x1e86   :  { %v1181_v41 = vadd.s32 %v1180_v39, %v1178_v34 }
0x1e96   :  { %v1452_v29 = vpop.xlane.xlu1 %1451 }
0x1e97   :  { %v1454_v36 = vcvt.f32.s32 %v1452_v29 }
0x1e99   :  { %v1455_v6 = vshll.u32 %v1454_v36, 16 }
0x1e9a   :  { %v1450_v37 = vpop.xlane.xlu1 %1449 }
0x1e9b   :  { %v1453_v38 = vcvt.f32.s32 %v1450_v37 }
0x1e9d   :  { %v1456_v40 = vadd.s32 %v1455_v6, %v1453_v38 }
0x1e9e   :  { %v1368_v43 = vpop.permute.xlu1 %1367 }
0x1e9f   :  { %vm1459_vm13 = vcmp.eq.s32.totalorder %v2146_v54, %v1456_v40  ;;  %v1369_v44 = vsel %vm1365_vm9, %v1368_v43, 0 }
0x1ea0   :  { %v1460_v46 = vsel %vm1459_vm13, %v1181_v41, 0  ;;  %v1383_v47 = vsel %vm1379_vm11, %v2252_v60, %v1369_v44 }
0x1ea1   :  { %v1461_v48 = vsel %vm1404_vm14, %v1460_v46, 0  ;;  %v1401_v49 = vsel %vm1400_vm12, %v2267_v28, %v1383_v47  ;;  %vm1468_vm14 = vcmp.eq.s32.totalorder %v2222_v58, 0 }
0x1ea2   :  { %v1462_v50 = vrot.slane %v1461_v48, 4  ;;  %v1413_v53 = vsel %vm1412_vm6, %v2272_v42, %v1401_v49 }
0x1ea3   :  { %v1430_v57 = vsel %vm1429_vm15, %v2287_v59, %v1413_v53 }
0x1ea4   :  { %v1463_v3 = vadd.s32 %v1462_v50, %v1461_v48  ;;  %v1441_v23 = vsel %vm1440_vm0, %v1439_v22, %v1430_v57 }
0x1ea5   :  { %v1458_v0 = vsel %vm1457_vm1, %v1456_v40, %v1441_v23 }
0x1ea6   :  { %v1464_v55 = vrot.slane %v1463_v3, 2 }
0x1ea8   :  { %v1465_v54 = vadd.s32 %v1464_v55, %v1463_v3 }
0x1eaa   :  { %v1466_v60 = vrot.slane %v1465_v54, 1 }
0x1eac   :  { %v1467_v28 = vadd.s32 %v1466_v60, %v1465_v54 }
0x1eae   :  { %v1469_v42 = vsel %vm1468_vm14, %v1467_v28, %v1458_v0 }
0x1eaf   :  { %1471 = vst.msk [vmem:[#allocation6] sm:$0x1] %vm1470_vm2, %v1469_v42 }
0x1eb0   :  { %1866 = shalt.err (!%p1863_p12)
}
0x1eb1   :  { %s1867_s6 = scalar_lea.hbm %s2346_s13, 16 }
0x1eb2   :  { %p1868_p13 = scmp.ne.s32.totalorder %s2346_s13, %s1867_s6  ;;  %p1871_p0 = scmp.lt.u32.totalorder %s1867_s6, %s2346_s13 }
0x1eb4   :  { %p1873_p1 = pnand %p1871_p0, %p1868_p13 }
0x1eb6   :  { %1876 = shalt.err (!%p1873_p1)
}
0x1eb7   :  { %1491 = dma.vmem_to_hbm [thread:$0]  %s1489_s14, 16, %s2346_s13, [#allocation7]  }
0x1eb8   :  { %1877 = dma.done.wait [#allocation5], 16  }
0x1eb9   :  { %1878 = vsyncadd [#allocation5], 4294967280 }
0x1eba   :  { %1879 = dma.done.wait [#allocation7], 16  }
0x1ebb   :  { %1880 = vsyncadd [#allocation7], 4294967280 }
0x1ebc   :  { %1498 = vsyncpa [#allocation5], 1 }
0x1ebd   :  { %1499 = vsyncpa [#allocation7], 1 }

</bundles_post_ra>
